<compile_context>
chip_gen: v7x
topology: tpu7x:2x2x1
jax: 0.10.0
libtpu: 0.0.40
codegen_flags: <defaults>
</compile_context>

<pallas_src>
import jax
import jax.numpy as jnp
from jax.experimental import pallas as pl
from jax.experimental.pallas import tpu as pltpu

B = 2             # batch
T = 8             # sequence length
INPUT_SIZE = 14
HIDDEN = 32
OUTPUT_SIZE = 14

B_PAD = 8         # sublane-aligned batch
D_PAD = 128       # lane-aligned input features (contraction dim of x @ Wih^T)
H_PAD = 128       # lane-aligned hidden (each gate = one full 128-lane block)
O_PAD = 128       # lane-aligned output


def lstm_kernel(x_ref, wih_ref, whh_ref, b_ref, wfc_ref, bfc_ref, out_ref,
                gx_ref):
    # x_ref:   (T*Bp, Dp)       time-major, batch- & feature-padded input
    # wih_ref: (Dp, 4*Hp)       transposed weight_ih, gate-block padded
    # whh_ref: (Hp, 4*Hp)       transposed weight_hh, gate-block padded
    # b_ref:   (1, 4*Hp)        bias_ih + bias_hh, gate-block padded
    # wfc_ref: (Hp, Op)         transposed fc weight, zero-padded
    # bfc_ref: (1, Op)          fc bias, zero-padded
    # out_ref: (Bp, Op)
    # gx_ref:  (T*Bp, 4*Hp)     VMEM scratch for the hoisted input projection
    Hp = whh_ref.shape[0]
    Bp = out_ref.shape[0]
    Tn = gx_ref.shape[0] // Bp

    # Hoisted input projection + folded bias: ONE MXU matmul for all timesteps.
    gx_ref[...] = (
        jnp.dot(x_ref[...], wih_ref[...], preferred_element_type=jnp.float32)
        + b_ref[...])

    whh = whh_ref[...]                      # hoisted: loaded once, reused T times
    h = jnp.zeros((Bp, Hp), jnp.float32)
    c = jnp.zeros((Bp, Hp), jnp.float32)

    # Static (fully unrolled) recurrence.  Per step: one small MXU matmul plus
    # the precomputed gates_x[t].  Gate order matches PyTorch: i, f, g, o.
    for t in range(Tn):
        gates = (gx_ref[t * Bp:(t + 1) * Bp, :]
                 + jnp.dot(h, whh, preferred_element_type=jnp.float32))
        i_g = jax.nn.sigmoid(gates[:, 0 * Hp:1 * Hp])
        f_g = jax.nn.sigmoid(gates[:, 1 * Hp:2 * Hp])
        g_g = jnp.tanh(gates[:, 2 * Hp:3 * Hp])
        o_g = jax.nn.sigmoid(gates[:, 3 * Hp:4 * Hp])
        c = f_g * c + i_g * g_g
        h = o_g * jnp.tanh(c)

    # Fused final Linear on the last hidden state, lane-dense (8, 128) store.
    out_ref[...] = (jnp.dot(h, wfc_ref[...],
                            preferred_element_type=jnp.float32)
                    + bfc_ref[...])


def _pad_gate_cols(w, H, Hp):
    """(..., 4H) -> (..., 4Hp): each PyTorch gate block moved to its own
    lane-aligned Hp-wide slot, zero-padded."""
    parts = []
    for g in range(4):
        blk = w[..., g * H:(g + 1) * H]
        pad_width = [(0, 0)] * (w.ndim - 1) + [(0, Hp - H)]
        parts.append(jnp.pad(blk, pad_width))
    return jnp.concatenate(parts, axis=-1)


def lstm_model_forward(x, w_ih, w_hh, b_ih, b_hh, w_fc, b_fc):
    """x: (B, T, D) float32. Weights in PyTorch layout:
       w_ih (4H, D), w_hh (4H, H), b_ih/b_hh (4H,), w_fc (O, H), b_fc (O,)."""
    Bx, Tx, Dx = x.shape
    H = w_hh.shape[1]
    O = w_fc.shape[0]
    Bp, Dp, Hp, Op = B_PAD, D_PAD, H_PAD, O_PAD

    # Time-major, batch- & feature-padded, flattened input: (T*Bp, Dp)
    x_tm = jnp.transpose(x.astype(jnp.float32), (1, 0, 2))          # (T, B, D)
    x_tm = jnp.pad(x_tm, ((0, 0), (0, Bp - Bx), (0, Dp - Dx)))      # (T, Bp, Dp)
    x2d = x_tm.reshape(Tx * Bp, Dp)

    # Gate-block / lane padded weights (all padding is zeros, so the padded
    # lanes of h/c stay exactly 0 and numerics are unchanged).
    wih_p = _pad_gate_cols(jnp.transpose(w_ih).astype(jnp.float32), H, Hp)
    wih_p = jnp.pad(wih_p, ((0, Dp - Dx), (0, 0)))                  # (Dp, 4Hp)
    whh_p = _pad_gate_cols(jnp.transpose(w_hh).astype(jnp.float32), H, Hp)
    whh_p = jnp.pad(whh_p, ((0, Hp - H), (0, 0)))                   # (Hp, 4Hp)
    bias_p = _pad_gate_cols((b_ih + b_hh).astype(jnp.float32)
                            .reshape(1, 4 * H), H, Hp)              # (1, 4Hp)
    wfc_p = jnp.pad(jnp.transpose(w_fc).astype(jnp.float32),
                    ((0, Hp - H), (0, Op - O)))                     # (Hp, Op)
    bfc_p = jnp.pad(b_fc.astype(jnp.float32).reshape(1, O),
                    ((0, 0), (0, Op - O)))                          # (1, Op)

    vmem_spec = pl.BlockSpec(memory_space=pltpu.MemorySpace.VMEM)
    out_p = pl.pallas_call(
        lstm_kernel,
        out_shape=jax.ShapeDtypeStruct((Bp, Op), jnp.float32),
        in_specs=[vmem_spec] * 6,
        out_specs=vmem_spec,
        scratch_shapes=[pltpu.VMEM((Tx * Bp, 4 * Hp), jnp.float32)],
    )(x2d, wih_p, whh_p, bias_p, wfc_p, bfc_p)

    return out_p[:Bx, :O]


def reference_forward(x, w_ih, w_hh, b_ih, b_hh, w_fc, b_fc):
    """Pure-JAX reference of the PyTorch LSTMModel.forward."""
    Bx, Tx, Dx = x.shape
    H = w_hh.shape[1]
    h = jnp.zeros((Bx, H), jnp.float32)
    c = jnp.zeros((Bx, H), jnp.float32)
    for t in range(Tx):
        gates = x[:, t, :] @ w_ih.T + b_ih + h @ w_hh.T + b_hh
        i_g = jax.nn.sigmoid(gates[:, 0 * H:1 * H])
        f_g = jax.nn.sigmoid(gates[:, 1 * H:2 * H])
        g_g = jnp.tanh(gates[:, 2 * H:3 * H])
        o_g = jax.nn.sigmoid(gates[:, 3 * H:4 * H])
        c = f_g * c + i_g * g_g
        h = o_g * jnp.tanh(c)
    return h @ w_fc.T + b_fc


if __name__ == "__main__":
    key = jax.random.PRNGKey(0)
    ks = jax.random.split(key, 7)
    bound = 1.0 / jnp.sqrt(HIDDEN)

    x = jax.random.normal(ks[0], (B, T, INPUT_SIZE), dtype=jnp.float32)
    w_ih = jax.random.uniform(ks[1], (4 * HIDDEN, INPUT_SIZE),
                              minval=-bound, maxval=bound, dtype=jnp.float32)
    w_hh = jax.random.uniform(ks[2], (4 * HIDDEN, HIDDEN),
                              minval=-bound, maxval=bound, dtype=jnp.float32)
    b_ih = jax.random.uniform(ks[3], (4 * HIDDEN,),
                              minval=-bound, maxval=bound, dtype=jnp.float32)
    b_hh = jax.random.uniform(ks[4], (4 * HIDDEN,),
                              minval=-bound, maxval=bound, dtype=jnp.float32)
    w_fc = jax.random.uniform(ks[5], (OUTPUT_SIZE, HIDDEN),
                              minval=-bound, maxval=bound, dtype=jnp.float32)
    b_fc = jax.random.uniform(ks[6], (OUTPUT_SIZE,),
                              minval=-bound, maxval=bound, dtype=jnp.float32)

    out = lstm_model_forward(x, w_ih, w_hh, b_ih, b_hh, w_fc, b_fc)
    out = jax.block_until_ready(out)

    ref = reference_forward(x, w_ih, w_hh, b_ih, b_hh, w_fc, b_fc)
    assert out.shape == (B, OUTPUT_SIZE)
    assert jnp.allclose(out, ref, atol=1e-5, rtol=1e-5), "mismatch vs reference"

    print("KERNEL_OK")
</pallas_src>

<mosaic_0001>
module attributes {stable_mosaic.version = 11 : i64} {
  func.func @lstm_kernel(%arg0: memref<64x128xf32, #tpu.memory_space<vmem>>, %arg1: memref<128x512xf32, #tpu.memory_space<vmem>>, %arg2: memref<128x512xf32, #tpu.memory_space<vmem>>, %arg3: memref<1x512xf32, #tpu.memory_space<vmem>>, %arg4: memref<128x128xf32, #tpu.memory_space<vmem>>, %arg5: memref<1x128xf32, #tpu.memory_space<vmem>>, %arg6: memref<8x128xf32, #tpu.memory_space<vmem>>, %arg7: memref<64x512xf32, #tpu.memory_space<vmem>>) attributes {dimension_semantics = [], scalar_prefetch = 0 : i64, scratch_operands = 1 : i64, tpu.core_type = #tpu.core_type<tc>} {
    %c0 = arith.constant 0 : index
    %c0_0 = arith.constant 0 : index
    %0 = vector.load %arg0[%c0, %c0_0] : memref<64x128xf32, #tpu.memory_space<vmem>>, vector<64x128xf32>
    %c0_1 = arith.constant 0 : index
    %c0_2 = arith.constant 0 : index
    %1 = vector.load %arg1[%c0_1, %c0_2] : memref<128x512xf32, #tpu.memory_space<vmem>>, vector<128x512xf32>
    %cst = arith.constant dense<0.000000e+00> : vector<64x512xf32>
    %2 = tpu.matmul %0, %1, %cst {dimension_numbers = #tpu.dot_dimension_numbers<[1], [0], [0], [1], [0, 0, 1, 1], [], []>} : vector<64x128xf32>, vector<128x512xf32>, vector<64x512xf32> -> vector<64x512xf32>
    %c0_3 = arith.constant 0 : index
    %c0_4 = arith.constant 0 : index
    %3 = vector.load %arg3[%c0_3, %c0_4] : memref<1x512xf32, #tpu.memory_space<vmem>>, vector<1x512xf32>
    %4 = vector.broadcast %3 : vector<1x512xf32> to vector<64x512xf32>
    %5 = arith.addf %2, %4 : vector<64x512xf32>
    %c0_5 = arith.constant 0 : index
    %c0_6 = arith.constant 0 : index
    %6 = vector.load %arg7[%c0_5, %c0_6] : memref<64x512xf32, #tpu.memory_space<vmem>>, vector<64x512xf32>
    tpu.vector_store %arg7[%c0_5, %c0_6], %5 {strides = array<i32>} : memref<64x512xf32, #tpu.memory_space<vmem>>, vector<64x512xf32>,
    %c0_7 = arith.constant 0 : index
    %c0_8 = arith.constant 0 : index
    %7 = vector.load %arg2[%c0_7, %c0_8] : memref<128x512xf32, #tpu.memory_space<vmem>>, vector<128x512xf32>
    %cst_9 = arith.constant 0.000000e+00 : f32
    %8 = vector.broadcast %cst_9 : f32 to vector<8x128xf32>
    %cst_10 = arith.constant 0.000000e+00 : f32
    %9 = vector.broadcast %cst_10 : f32 to vector<8x128xf32>
    %c0_11 = arith.constant 0 : index
    %c0_12 = arith.constant 0 : index
    %10 = vector.load %arg7[%c0_11, %c0_12] : memref<64x512xf32, #tpu.memory_space<vmem>>, vector<8x512xf32>
    %cst_13 = arith.constant dense<0.000000e+00> : vector<8x512xf32>
    %11 = tpu.matmul %8, %7, %cst_13 {dimension_numbers = #tpu.dot_dimension_numbers<[1], [0], [0], [1], [0, 0, 1, 1], [], []>} : vector<8x128xf32>, vector<128x512xf32>, vector<8x512xf32> -> vector<8x512xf32>
    %12 = arith.addf %10, %11 : vector<8x512xf32>
    %13 = vector.extract_strided_slice %12 {offsets = [0, 0], sizes = [8, 128], strides = [1, 1]} : vector<8x512xf32> to vector<8x128xf32>
    %14 = arith.negf %13 : vector<8x128xf32>
    %15 = math.exp %14 : vector<8x128xf32>
    %cst_14 = arith.constant 1.000000e+00 : f32
    %16 = vector.broadcast %cst_14 : f32 to vector<8x128xf32>
    %17 = arith.addf %16, %15 : vector<8x128xf32>
    %18 = arith.divf %16, %17 : vector<8x128xf32>
    %19 = vector.extract_strided_slice %12 {offsets = [0, 128], sizes = [8, 128], strides = [1, 1]} : vector<8x512xf32> to vector<8x128xf32>
    %20 = arith.negf %19 : vector<8x128xf32>
    %21 = math.exp %20 : vector<8x128xf32>
    %cst_15 = arith.constant 1.000000e+00 : f32
    %22 = vector.broadcast %cst_15 : f32 to vector<8x128xf32>
    %23 = arith.addf %22, %21 : vector<8x128xf32>
    %24 = arith.divf %22, %23 : vector<8x128xf32>
    %25 = vector.extract_strided_slice %12 {offsets = [0, 256], sizes = [8, 128], strides = [1, 1]} : vector<8x512xf32> to vector<8x128xf32>
    %26 = math.tanh %25 : vector<8x128xf32>
    %27 = vector.extract_strided_slice %12 {offsets = [0, 384], sizes = [8, 128], strides = [1, 1]} : vector<8x512xf32> to vector<8x128xf32>
    %28 = arith.negf %27 : vector<8x128xf32>
    %29 = math.exp %28 : vector<8x128xf32>
    %cst_16 = arith.constant 1.000000e+00 : f32
    %30 = vector.broadcast %cst_16 : f32 to vector<8x128xf32>
    %31 = arith.addf %30, %29 : vector<8x128xf32>
    %32 = arith.divf %30, %31 : vector<8x128xf32>
    %33 = arith.mulf %24, %9 : vector<8x128xf32>
    %34 = arith.mulf %18, %26 : vector<8x128xf32>
    %35 = arith.addf %33, %34 : vector<8x128xf32>
    %36 = math.tanh %35 : vector<8x128xf32>
    %37 = arith.mulf %32, %36 : vector<8x128xf32>
    %c8 = arith.constant 8 : index
    %c0_17 = arith.constant 0 : index
    %38 = vector.load %arg7[%c8, %c0_17] : memref<64x512xf32, #tpu.memory_space<vmem>>, vector<8x512xf32>
    %cst_18 = arith.constant dense<0.000000e+00> : vector<8x512xf32>
    %39 = tpu.matmul %37, %7, %cst_18 {dimension_numbers = #tpu.dot_dimension_numbers<[1], [0], [0], [1], [0, 0, 1, 1], [], []>} : vector<8x128xf32>, vector<128x512xf32>, vector<8x512xf32> -> vector<8x512xf32>
    %40 = arith.addf %38, %39 : vector<8x512xf32>
    %41 = vector.extract_strided_slice %40 {offsets = [0, 0], sizes = [8, 128], strides = [1, 1]} : vector<8x512xf32> to vector<8x128xf32>
    %42 = arith.negf %41 : vector<8x128xf32>
    %43 = math.exp %42 : vector<8x128xf32>
    %cst_19 = arith.constant 1.000000e+00 : f32
    %44 = vector.broadcast %cst_19 : f32 to vector<8x128xf32>
    %45 = arith.addf %44, %43 : vector<8x128xf32>
    %46 = arith.divf %44, %45 : vector<8x128xf32>
    %47 = vector.extract_strided_slice %40 {offsets = [0, 128], sizes = [8, 128], strides = [1, 1]} : vector<8x512xf32> to vector<8x128xf32>
    %48 = arith.negf %47 : vector<8x128xf32>
    %49 = math.exp %48 : vector<8x128xf32>
    %cst_20 = arith.constant 1.000000e+00 : f32
    %50 = vector.broadcast %cst_20 : f32 to vector<8x128xf32>
    %51 = arith.addf %50, %49 : vector<8x128xf32>
    %52 = arith.divf %50, %51 : vector<8x128xf32>
    %53 = vector.extract_strided_slice %40 {offsets = [0, 256], sizes = [8, 128], strides = [1, 1]} : vector<8x512xf32> to vector<8x128xf32>
    %54 = math.tanh %53 : vector<8x128xf32>
    %55 = vector.extract_strided_slice %40 {offsets = [0, 384], sizes = [8, 128], strides = [1, 1]} : vector<8x512xf32> to vector<8x128xf32>
    %56 = arith.negf %55 : vector<8x128xf32>
    %57 = math.exp %56 : vector<8x128xf32>
    %cst_21 = arith.constant 1.000000e+00 : f32
    %58 = vector.broadcast %cst_21 : f32 to vector<8x128xf32>
    %59 = arith.addf %58, %57 : vector<8x128xf32>
    %60 = arith.divf %58, %59 : vector<8x128xf32>
    %61 = arith.mulf %52, %35 : vector<8x128xf32>
    %62 = arith.mulf %46, %54 : vector<8x128xf32>
    %63 = arith.addf %61, %62 : vector<8x128xf32>
    %64 = math.tanh %63 : vector<8x128xf32>
    %65 = arith.mulf %60, %64 : vector<8x128xf32>
    %c16 = arith.constant 16 : index
    %c0_22 = arith.constant 0 : index
    %66 = vector.load %arg7[%c16, %c0_22] : memref<64x512xf32, #tpu.memory_space<vmem>>, vector<8x512xf32>
    %cst_23 = arith.constant dense<0.000000e+00> : vector<8x512xf32>
    %67 = tpu.matmul %65, %7, %cst_23 {dimension_numbers = #tpu.dot_dimension_numbers<[1], [0], [0], [1], [0, 0, 1, 1], [], []>} : vector<8x128xf32>, vector<128x512xf32>, vector<8x512xf32> -> vector<8x512xf32>
    %68 = arith.addf %66, %67 : vector<8x512xf32>
    %69 = vector.extract_strided_slice %68 {offsets = [0, 0], sizes = [8, 128], strides = [1, 1]} : vector<8x512xf32> to vector<8x128xf32>
    %70 = arith.negf %69 : vector<8x128xf32>
    %71 = math.exp %70 : vector<8x128xf32>
    %cst_24 = arith.constant 1.000000e+00 : f32
    %72 = vector.broadcast %cst_24 : f32 to vector<8x128xf32>
    %73 = arith.addf %72, %71 : vector<8x128xf32>
    %74 = arith.divf %72, %73 : vector<8x128xf32>
    %75 = vector.extract_strided_slice %68 {offsets = [0, 128], sizes = [8, 128], strides = [1, 1]} : vector<8x512xf32> to vector<8x128xf32>
    %76 = arith.negf %75 : vector<8x128xf32>
    %77 = math.exp %76 : vector<8x128xf32>
    %cst_25 = arith.constant 1.000000e+00 : f32
    %78 = vector.broadcast %cst_25 : f32 to vector<8x128xf32>
    %79 = arith.addf %78, %77 : vector<8x128xf32>
    %80 = arith.divf %78, %79 : vector<8x128xf32>
    %81 = vector.extract_strided_slice %68 {offsets = [0, 256], sizes = [8, 128], strides = [1, 1]} : vector<8x512xf32> to vector<8x128xf32>
    %82 = math.tanh %81 : vector<8x128xf32>
    %83 = vector.extract_strided_slice %68 {offsets = [0, 384], sizes = [8, 128], strides = [1, 1]} : vector<8x512xf32> to vector<8x128xf32>
    %84 = arith.negf %83 : vector<8x128xf32>
    %85 = math.exp %84 : vector<8x128xf32>
    %cst_26 = arith.constant 1.000000e+00 : f32
    %86 = vector.broadcast %cst_26 : f32 to vector<8x128xf32>
    %87 = arith.addf %86, %85 : vector<8x128xf32>
    %88 = arith.divf %86, %87 : vector<8x128xf32>
    %89 = arith.mulf %80, %63 : vector<8x128xf32>
    %90 = arith.mulf %74, %82 : vector<8x128xf32>
    %91 = arith.addf %89, %90 : vector<8x128xf32>
    %92 = math.tanh %91 : vector<8x128xf32>
    %93 = arith.mulf %88, %92 : vector<8x128xf32>
    %c24 = arith.constant 24 : index
    %c0_27 = arith.constant 0 : index
    %94 = vector.load %arg7[%c24, %c0_27] : memref<64x512xf32, #tpu.memory_space<vmem>>, vector<8x512xf32>
    %cst_28 = arith.constant dense<0.000000e+00> : vector<8x512xf32>
    %95 = tpu.matmul %93, %7, %cst_28 {dimension_numbers = #tpu.dot_dimension_numbers<[1], [0], [0], [1], [0, 0, 1, 1], [], []>} : vector<8x128xf32>, vector<128x512xf32>, vector<8x512xf32> -> vector<8x512xf32>
    %96 = arith.addf %94, %95 : vector<8x512xf32>
    %97 = vector.extract_strided_slice %96 {offsets = [0, 0], sizes = [8, 128], strides = [1, 1]} : vector<8x512xf32> to vector<8x128xf32>
    %98 = arith.negf %97 : vector<8x128xf32>
    %99 = math.exp %98 : vector<8x128xf32>
    %cst_29 = arith.constant 1.000000e+00 : f32
    %100 = vector.broadcast %cst_29 : f32 to vector<8x128xf32>
    %101 = arith.addf %100, %99 : vector<8x128xf32>
    %102 = arith.divf %100, %101 : vector<8x128xf32>
    %103 = vector.extract_strided_slice %96 {offsets = [0, 128], sizes = [8, 128], strides = [1, 1]} : vector<8x512xf32> to vector<8x128xf32>
    %104 = arith.negf %103 : vector<8x128xf32>
    %105 = math.exp %104 : vector<8x128xf32>
    %cst_30 = arith.constant 1.000000e+00 : f32
    %106 = vector.broadcast %cst_30 : f32 to vector<8x128xf32>
    %107 = arith.addf %106, %105 : vector<8x128xf32>
    %108 = arith.divf %106, %107 : vector<8x128xf32>
    %109 = vector.extract_strided_slice %96 {offsets = [0, 256], sizes = [8, 128], strides = [1, 1]} : vector<8x512xf32> to vector<8x128xf32>
    %110 = math.tanh %109 : vector<8x128xf32>
    %111 = vector.extract_strided_slice %96 {offsets = [0, 384], sizes = [8, 128], strides = [1, 1]} : vector<8x512xf32> to vector<8x128xf32>
    %112 = arith.negf %111 : vector<8x128xf32>
    %113 = math.exp %112 : vector<8x128xf32>
    %cst_31 = arith.constant 1.000000e+00 : f32
    %114 = vector.broadcast %cst_31 : f32 to vector<8x128xf32>
    %115 = arith.addf %114, %113 : vector<8x128xf32>
    %116 = arith.divf %114, %115 : vector<8x128xf32>
    %117 = arith.mulf %108, %91 : vector<8x128xf32>
    %118 = arith.mulf %102, %110 : vector<8x128xf32>
    %119 = arith.addf %117, %118 : vector<8x128xf32>
    %120 = math.tanh %119 : vector<8x128xf32>
    %121 = arith.mulf %116, %120 : vector<8x128xf32>
    %c32 = arith.constant 32 : index
    %c0_32 = arith.constant 0 : index
    %122 = vector.load %arg7[%c32, %c0_32] : memref<64x512xf32, #tpu.memory_space<vmem>>, vector<8x512xf32>
    %cst_33 = arith.constant dense<0.000000e+00> : vector<8x512xf32>
    %123 = tpu.matmul %121, %7, %cst_33 {dimension_numbers = #tpu.dot_dimension_numbers<[1], [0], [0], [1], [0, 0, 1, 1], [], []>} : vector<8x128xf32>, vector<128x512xf32>, vector<8x512xf32> -> vector<8x512xf32>
    %124 = arith.addf %122, %123 : vector<8x512xf32>
    %125 = vector.extract_strided_slice %124 {offsets = [0, 0], sizes = [8, 128], strides = [1, 1]} : vector<8x512xf32> to vector<8x128xf32>
    %126 = arith.negf %125 : vector<8x128xf32>
    %127 = math.exp %126 : vector<8x128xf32>
    %cst_34 = arith.constant 1.000000e+00 : f32
    %128 = vector.broadcast %cst_34 : f32 to vector<8x128xf32>
    %129 = arith.addf %128, %127 : vector<8x128xf32>
    %130 = arith.divf %128, %129 : vector<8x128xf32>
    %131 = vector.extract_strided_slice %124 {offsets = [0, 128], sizes = [8, 128], strides = [1, 1]} : vector<8x512xf32> to vector<8x128xf32>
    %132 = arith.negf %131 : vector<8x128xf32>
    %133 = math.exp %132 : vector<8x128xf32>
    %cst_35 = arith.constant 1.000000e+00 : f32
    %134 = vector.broadcast %cst_35 : f32 to vector<8x128xf32>
    %135 = arith.addf %134, %133 : vector<8x128xf32>
    %136 = arith.divf %134, %135 : vector<8x128xf32>
    %137 = vector.extract_strided_slice %124 {offsets = [0, 256], sizes = [8, 128], strides = [1, 1]} : vector<8x512xf32> to vector<8x128xf32>
    %138 = math.tanh %137 : vector<8x128xf32>
    %139 = vector.extract_strided_slice %124 {offsets = [0, 384], sizes = [8, 128], strides = [1, 1]} : vector<8x512xf32> to vector<8x128xf32>
    %140 = arith.negf %139 : vector<8x128xf32>
    %141 = math.exp %140 : vector<8x128xf32>
    %cst_36 = arith.constant 1.000000e+00 : f32
    %142 = vector.broadcast %cst_36 : f32 to vector<8x128xf32>
    %143 = arith.addf %142, %141 : vector<8x128xf32>
    %144 = arith.divf %142, %143 : vector<8x128xf32>
    %145 = arith.mulf %136, %119 : vector<8x128xf32>
    %146 = arith.mulf %130, %138 : vector<8x128xf32>
    %147 = arith.addf %145, %146 : vector<8x128xf32>
    %148 = math.tanh %147 : vector<8x128xf32>
    %149 = arith.mulf %144, %148 : vector<8x128xf32>
    %c40 = arith.constant 40 : index
    %c0_37 = arith.constant 0 : index
    %150 = vector.load %arg7[%c40, %c0_37] : memref<64x512xf32, #tpu.memory_space<vmem>>, vector<8x512xf32>
    %cst_38 = arith.constant dense<0.000000e+00> : vector<8x512xf32>
    %151 = tpu.matmul %149, %7, %cst_38 {dimension_numbers = #tpu.dot_dimension_numbers<[1], [0], [0], [1], [0, 0, 1, 1], [], []>} : vector<8x128xf32>, vector<128x512xf32>, vector<8x512xf32> -> vector<8x512xf32>
    %152 = arith.addf %150, %151 : vector<8x512xf32>
    %153 = vector.extract_strided_slice %152 {offsets = [0, 0], sizes = [8, 128], strides = [1, 1]} : vector<8x512xf32> to vector<8x128xf32>
    %154 = arith.negf %153 : vector<8x128xf32>
    %155 = math.exp %154 : vector<8x128xf32>
    %cst_39 = arith.constant 1.000000e+00 : f32
    %156 = vector.broadcast %cst_39 : f32 to vector<8x128xf32>
    %157 = arith.addf %156, %155 : vector<8x128xf32>
    %158 = arith.divf %156, %157 : vector<8x128xf32>
    %159 = vector.extract_strided_slice %152 {offsets = [0, 128], sizes = [8, 128], strides = [1, 1]} : vector<8x512xf32> to vector<8x128xf32>
    %160 = arith.negf %159 : vector<8x128xf32>
    %161 = math.exp %160 : vector<8x128xf32>
    %cst_40 = arith.constant 1.000000e+00 : f32
    %162 = vector.broadcast %cst_40 : f32 to vector<8x128xf32>
    %163 = arith.addf %162, %161 : vector<8x128xf32>
    %164 = arith.divf %162, %163 : vector<8x128xf32>
    %165 = vector.extract_strided_slice %152 {offsets = [0, 256], sizes = [8, 128], strides = [1, 1]} : vector<8x512xf32> to vector<8x128xf32>
    %166 = math.tanh %165 : vector<8x128xf32>
    %167 = vector.extract_strided_slice %152 {offsets = [0, 384], sizes = [8, 128], strides = [1, 1]} : vector<8x512xf32> to vector<8x128xf32>
    %168 = arith.negf %167 : vector<8x128xf32>
    %169 = math.exp %168 : vector<8x128xf32>
    %cst_41 = arith.constant 1.000000e+00 : f32
    %170 = vector.broadcast %cst_41 : f32 to vector<8x128xf32>
    %171 = arith.addf %170, %169 : vector<8x128xf32>
    %172 = arith.divf %170, %171 : vector<8x128xf32>
    %173 = arith.mulf %164, %147 : vector<8x128xf32>
    %174 = arith.mulf %158, %166 : vector<8x128xf32>
    %175 = arith.addf %173, %174 : vector<8x128xf32>
    %176 = math.tanh %175 : vector<8x128xf32>
    %177 = arith.mulf %172, %176 : vector<8x128xf32>
    %c48 = arith.constant 48 : index
    %c0_42 = arith.constant 0 : index
    %178 = vector.load %arg7[%c48, %c0_42] : memref<64x512xf32, #tpu.memory_space<vmem>>, vector<8x512xf32>
    %cst_43 = arith.constant dense<0.000000e+00> : vector<8x512xf32>
    %179 = tpu.matmul %177, %7, %cst_43 {dimension_numbers = #tpu.dot_dimension_numbers<[1], [0], [0], [1], [0, 0, 1, 1], [], []>} : vector<8x128xf32>, vector<128x512xf32>, vector<8x512xf32> -> vector<8x512xf32>
    %180 = arith.addf %178, %179 : vector<8x512xf32>
    %181 = vector.extract_strided_slice %180 {offsets = [0, 0], sizes = [8, 128], strides = [1, 1]} : vector<8x512xf32> to vector<8x128xf32>
    %182 = arith.negf %181 : vector<8x128xf32>
    %183 = math.exp %182 : vector<8x128xf32>
    %cst_44 = arith.constant 1.000000e+00 : f32
    %184 = vector.broadcast %cst_44 : f32 to vector<8x128xf32>
    %185 = arith.addf %184, %183 : vector<8x128xf32>
    %186 = arith.divf %184, %185 : vector<8x128xf32>
    %187 = vector.extract_strided_slice %180 {offsets = [0, 128], sizes = [8, 128], strides = [1, 1]} : vector<8x512xf32> to vector<8x128xf32>
    %188 = arith.negf %187 : vector<8x128xf32>
    %189 = math.exp %188 : vector<8x128xf32>
    %cst_45 = arith.constant 1.000000e+00 : f32
    %190 = vector.broadcast %cst_45 : f32 to vector<8x128xf32>
    %191 = arith.addf %190, %189 : vector<8x128xf32>
    %192 = arith.divf %190, %191 : vector<8x128xf32>
    %193 = vector.extract_strided_slice %180 {offsets = [0, 256], sizes = [8, 128], strides = [1, 1]} : vector<8x512xf32> to vector<8x128xf32>
    %194 = math.tanh %193 : vector<8x128xf32>
    %195 = vector.extract_strided_slice %180 {offsets = [0, 384], sizes = [8, 128], strides = [1, 1]} : vector<8x512xf32> to vector<8x128xf32>
    %196 = arith.negf %195 : vector<8x128xf32>
    %197 = math.exp %196 : vector<8x128xf32>
    %cst_46 = arith.constant 1.000000e+00 : f32
    %198 = vector.broadcast %cst_46 : f32 to vector<8x128xf32>
    %199 = arith.addf %198, %197 : vector<8x128xf32>
    %200 = arith.divf %198, %199 : vector<8x128xf32>
    %201 = arith.mulf %192, %175 : vector<8x128xf32>
    %202 = arith.mulf %186, %194 : vector<8x128xf32>
    %203 = arith.addf %201, %202 : vector<8x128xf32>
    %204 = math.tanh %203 : vector<8x128xf32>
    %205 = arith.mulf %200, %204 : vector<8x128xf32>
    %c56 = arith.constant 56 : index
    %c0_47 = arith.constant 0 : index
    %206 = vector.load %arg7[%c56, %c0_47] : memref<64x512xf32, #tpu.memory_space<vmem>>, vector<8x512xf32>
    %cst_48 = arith.constant dense<0.000000e+00> : vector<8x512xf32>
    %207 = tpu.matmul %205, %7, %cst_48 {dimension_numbers = #tpu.dot_dimension_numbers<[1], [0], [0], [1], [0, 0, 1, 1], [], []>} : vector<8x128xf32>, vector<128x512xf32>, vector<8x512xf32> -> vector<8x512xf32>
    %208 = arith.addf %206, %207 : vector<8x512xf32>
    %209 = vector.extract_strided_slice %208 {offsets = [0, 0], sizes = [8, 128], strides = [1, 1]} : vector<8x512xf32> to vector<8x128xf32>
    %210 = arith.negf %209 : vector<8x128xf32>
    %211 = math.exp %210 : vector<8x128xf32>
    %cst_49 = arith.constant 1.000000e+00 : f32
    %212 = vector.broadcast %cst_49 : f32 to vector<8x128xf32>
    %213 = arith.addf %212, %211 : vector<8x128xf32>
    %214 = arith.divf %212, %213 : vector<8x128xf32>
    %215 = vector.extract_strided_slice %208 {offsets = [0, 128], sizes = [8, 128], strides = [1, 1]} : vector<8x512xf32> to vector<8x128xf32>
    %216 = arith.negf %215 : vector<8x128xf32>
    %217 = math.exp %216 : vector<8x128xf32>
    %cst_50 = arith.constant 1.000000e+00 : f32
    %218 = vector.broadcast %cst_50 : f32 to vector<8x128xf32>
    %219 = arith.addf %218, %217 : vector<8x128xf32>
    %220 = arith.divf %218, %219 : vector<8x128xf32>
    %221 = vector.extract_strided_slice %208 {offsets = [0, 256], sizes = [8, 128], strides = [1, 1]} : vector<8x512xf32> to vector<8x128xf32>
    %222 = math.tanh %221 : vector<8x128xf32>
    %223 = vector.extract_strided_slice %208 {offsets = [0, 384], sizes = [8, 128], strides = [1, 1]} : vector<8x512xf32> to vector<8x128xf32>
    %224 = arith.negf %223 : vector<8x128xf32>
    %225 = math.exp %224 : vector<8x128xf32>
    %cst_51 = arith.constant 1.000000e+00 : f32
    %226 = vector.broadcast %cst_51 : f32 to vector<8x128xf32>
    %227 = arith.addf %226, %225 : vector<8x128xf32>
    %228 = arith.divf %226, %227 : vector<8x128xf32>
    %229 = arith.mulf %220, %203 : vector<8x128xf32>
    %230 = arith.mulf %214, %222 : vector<8x128xf32>
    %231 = arith.addf %229, %230 : vector<8x128xf32>
    %232 = math.tanh %231 : vector<8x128xf32>
    %233 = arith.mulf %228, %232 : vector<8x128xf32>
    %c0_52 = arith.constant 0 : index
    %c0_53 = arith.constant 0 : index
    %234 = vector.load %arg4[%c0_52, %c0_53] : memref<128x128xf32, #tpu.memory_space<vmem>>, vector<128x128xf32>
    %cst_54 = arith.constant dense<0.000000e+00> : vector<8x128xf32>
    %235 = tpu.matmul %233, %234, %cst_54 {dimension_numbers = #tpu.dot_dimension_numbers<[1], [0], [0], [1], [0, 0, 1, 1], [], []>} : vector<8x128xf32>, vector<128x128xf32>, vector<8x128xf32> -> vector<8x128xf32>
    %c0_55 = arith.constant 0 : index
    %c0_56 = arith.constant 0 : index
    %236 = vector.load %arg5[%c0_55, %c0_56] : memref<1x128xf32, #tpu.memory_space<vmem>>, vector<1x128xf32>
    %237 = vector.broadcast %236 : vector<1x128xf32> to vector<8x128xf32>
    %238 = arith.addf %235, %237 : vector<8x128xf32>
    %c0_57 = arith.constant 0 : index
    %c0_58 = arith.constant 0 : index
    %239 = vector.load %arg6[%c0_57, %c0_58] : memref<8x128xf32, #tpu.memory_space<vmem>>, vector<8x128xf32>
    tpu.vector_store %arg6[%c0_57, %c0_58], %238 {strides = array<i32>} : memref<8x128xf32, #tpu.memory_space<vmem>>, vector<8x128xf32>,
    return
  }
}

</mosaic_0001>

<bundles_post_ra>
// kernel: tpu_custom_call.1
= control target key start
LH: loop header
LB: loop body
LE: loop exit
PB: predicated region body
PF: predicated region fallthrough
CT: control target
= control target key end

     0   :  { %11 = vsyncpa [#allocation4], 0  ;;  %s3552_s0 = inlined_call_operand.hbm [shape: f32[64,128], index: 0, kind: input, shape index: {}]   ;;  %s3553_s1 = inlined_call_operand.hbm [shape: f32[128,512], index: 1, kind: input, shape index: {}]   ;;  %s3554_s2 = inlined_call_operand.hbm [shape: f32[128,512], index: 2, kind: input, shape index: {}]   ;;  %s3555_s3 = inlined_call_operand.vmem [shape: f32[1,512], index: 3, kind: input, shape index: {}]   ;;  %s3556_s4 = inlined_call_operand.hbm [shape: f32[128,128], index: 4, kind: input, shape index: {}]   ;;  %s3557_s5 = inlined_call_operand.vmem [shape: f32[1,128], index: 5, kind: input, shape index: {}]   ;;  %s3558_s6 = inlined_call_operand.hbm [shape: f32[8,128], index: 6, kind: output, shape index: {}]  }
   0x1   :  { %12 = vsyncpa [#allocation7], 0 }
   0x2   :  { %13 = vsyncpa [#allocation10], 0 }
   0x3   :  { %14 = vsyncpa [#allocation5], 0  ;;  %s2997_s21 = smov [#allocation6]   ;;  %s2879_s25 = scalar_lea.hbm %s3553_s1, 8192 }
   0x4   :  { %s32_s22 = sshll.u32 %s2997_s21, 4  ;;  %p2880_p0 = scmp.ne.s32.totalorder %s3553_s1, %s2879_s25  ;;  %s33_s22 = int_to_ptr.vmem [resolvable:$true] %s32_s22 }
   0x5   :  { %p2883_p1 = scmp.lt.u32.totalorder %s2879_s25, %s3553_s1 }
   0x7   :  { %p2885_p2 = pnand %p2883_p1, %p2880_p0 }
   0x9   :  { %2888 = shalt.err (!%p2885_p2)
}
   0xa   :  { %s2889_s30 = scalar_lea.vmem %s33_s22, 8192  ;;  %p2894_p4 = scmp.lt.s32.totalorder %s33_s22, %s33_s22 }
   0xb   :  { %p2890_p3 = scmp.ne.s32.totalorder %s33_s22, %s2889_s30  ;;  %p2895_p5 = scmp.lt.s32.totalorder %s2889_s30, %s2889_s30 }
   0xd   :  { %p2896_p6 = por %p2895_p5, %p2894_p4 }
   0xf   :  { %p2897_p7 = pnand %p2896_p6, %p2890_p3 }
  0x11   :  { %2900 = shalt.err (!%p2897_p7)
}
  0x12   :  { %s2998_s7 = smov 512   ;;  %s2999_s8 = smov 32  }
  0x13   :  { %38 = dma.hbm_to_vmem [thread:$0]  %s3553_s1, 8192, %s33_s22, [#allocation7], %s2998_s7, %s2998_s7, %s2999_s8  }
  0x14   :  { %s3000_s11 = smov [#allocation3]   ;;  %s2901_s15 = scalar_lea.hbm %s3552_s0, 1024 }
  0x15   :  { %s20_s12 = sshll.u32 %s3000_s11, 4  ;;  %p2902_p8 = scmp.ne.s32.totalorder %s3552_s0, %s2901_s15  ;;  %s21_s12 = int_to_ptr.vmem [resolvable:$true] %s20_s12 }
  0x16   :  { %p2905_p9 = scmp.lt.u32.totalorder %s2901_s15, %s3552_s0 }
  0x18   :  { %p2907_p10 = pnand %p2905_p9, %p2902_p8 }
  0x1a   :  { %2910 = shalt.err (!%p2907_p10)
}
  0x1b   :  { %s2911_s20 = scalar_lea.vmem %s21_s12, 1024  ;;  %p2916_p12 = scmp.lt.s32.totalorder %s21_s12, %s21_s12 }
  0x1c   :  { %p2912_p11 = scmp.ne.s32.totalorder %s21_s12, %s2911_s20  ;;  %p2917_p13 = scmp.lt.s32.totalorder %s2911_s20, %s2911_s20 }
  0x1e   :  { %p2918_p0 = por %p2917_p13, %p2916_p12 }
  0x20   :  { %p2919_p1 = pnand %p2918_p0, %p2912_p11 }
  0x22   :  { %2922 = shalt.err (!%p2919_p1)
}
  0x23   :  { %s3001_s1 = smov 128   ;;  %s3002_s21 = smov 8  }
  0x24   :  { %26 = dma.hbm_to_vmem [thread:$0]  %s3552_s0, 1024, %s21_s12, [#allocation4], %s3001_s1, %s3001_s1, %s3002_s21  }
  0x25   :  { %s3003_s24 = smov [#allocation8]   ;;  %s3004_s26 = smov [#allocation9]  }
  0x26   :  { %s44_s25 = sshll.u32 %s3003_s24, 4  ;;  %s58_s27 = sshll.u32 %s3004_s26, 4  ;;  %s45_s25 = int_to_ptr.vmem [resolvable:$true] %s44_s25  ;;  %s3074_s27 = int_to_ptr.vmem [resolvable:$true] %s58_s27 }
  0x27   :  { %s2923_s30 = scalar_lea.hbm %s3554_s2, 8192 }
  0x28   :  { %p2924_p2 = scmp.ne.s32.totalorder %s3554_s2, %s2923_s30  ;;  %p2927_p3 = scmp.lt.u32.totalorder %s2923_s30, %s3554_s2 }
  0x2a   :  { %p2929_p4 = pnand %p2927_p3, %p2924_p2 }
  0x2c   :  { %2932 = shalt.err (!%p2929_p4)
}
  0x2d   :  { %s2933_s0 = scalar_lea.vmem %s45_s25, 8192  ;;  %p2938_p6 = scmp.lt.s32.totalorder %s45_s25, %s45_s25 }
  0x2e   :  { %p2934_p5 = scmp.ne.s32.totalorder %s45_s25, %s2933_s0  ;;  %p2939_p7 = scmp.lt.s32.totalorder %s2933_s0, %s2933_s0 }
  0x30   :  { %p2940_p8 = por %p2939_p7, %p2938_p6 }
  0x32   :  { %p2941_p9 = pnand %p2940_p8, %p2934_p5 }
  0x34   :  { %2944 = shalt.err (!%p2941_p9)
}
  0x35   :  { %50 = dma.hbm_to_vmem [thread:$0]  %s3554_s2, 8192, %s45_s25, [#allocation7], %s2998_s7, %s2998_s7, %s2999_s8  }
  0x36   :  { %s2945_s17 = scalar_lea.hbm %s3556_s4, 2048 }
  0x37   :  { %p2946_p10 = scmp.ne.s32.totalorder %s3556_s4, %s2945_s17  ;;  %p2949_p11 = scmp.lt.u32.totalorder %s2945_s17, %s3556_s4 }
  0x39   :  { %p2951_p12 = pnand %p2949_p11, %p2946_p10 }
  0x3b   :  { %2954 = shalt.err (!%p2951_p12)
}
  0x3c   :  { %s2955_s23 = scalar_lea.vmem %s3074_s27, 2048  ;;  %p2960_p0 = scmp.lt.s32.totalorder %s3074_s27, %s3074_s27 }
  0x3d   :  { %p2956_p13 = scmp.ne.s32.totalorder %s3074_s27, %s2955_s23  ;;  %p2961_p1 = scmp.lt.s32.totalorder %s2955_s23, %s2955_s23 }
  0x3f   :  { %p2962_p2 = por %p2961_p1, %p2960_p0 }
  0x41   :  { %p2963_p3 = pnand %p2962_p2, %p2956_p13 }
  0x43   :  { %2966 = shalt.err (!%p2963_p3)
}
  0x44   :  { %64 = dma.hbm_to_vmem [thread:$0]  %s3556_s4, 2048, %s3074_s27, [#allocation10], %s3001_s1, %s3001_s1, %s3002_s21  }
  0x45   :  { %2989 = dma.done.wait [#allocation4], 1024  }
  0x46   :  { %2990 = vsyncadd [#allocation4], 4294966272 }
  0x47   :  { %2991 = dma.done.wait [#allocation7], 16384  }
  0x48   :  { %2992 = vsyncadd [#allocation7], 4294950912 }
  0x49   :  { %2993 = dma.done.wait [#allocation10], 2048  }
  0x4a   :  { %2994 = vsyncadd [#allocation10], 4294965248  ;;  %v3005_v0 = vmov 0.0   ;;  %v88_v1 = vld [vmem:[#allocation6 + $0x8] sm:$0xff]  ;;  %v90_v3 = vld [vmem:[#allocation6 + $0x18] sm:$0xff]  ;;  %vm3007_vm0 = vmmov 0  }
  0x4b   :  { %237 = vmatprep.mubr.f32.mxu0 %v3005_v0  ;;  %350 = vmatprep.mubr.f32.mxu1 %v3005_v0  ;;  %v92_v2 = vld [vmem:[#allocation6 + $0x28] sm:$0xff]  ;;  %v94_v5 = vld [vmem:[#allocation6 + $0x38] sm:$0xff]  ;;  %v87_v6 = vld [vmem:[#allocation6] sm:$0xff]  ;;  %s3008_s21 = smov [#allocation11]  }
  0x4c   :  { %v2075_v4 = vpack.c.bf16 %v92_v2, %v88_v1  ;;  %v91_v7 = vld [vmem:[#allocation6 + $0x20] sm:$0xff]  ;;  %v2107_v8 = vpack.c.bf16 %v94_v5, %v90_v3  ;;  %v89_v10 = vld [vmem:[#allocation6 + $0x10] sm:$0xff]  ;;  %v96_v12 = vld [vmem:[#allocation6 + $0x48] sm:$0xff]  ;;  %s1987_s24 = sshll.u32 %s3008_s21, 4  ;;  %s1988_s24 = int_to_ptr.vmem [resolvable:$true] %s1987_s24 }
  0x4d   :  { %v2077_v9 = vpack.c.bf16 %v91_v7, %v87_v6  ;;  %v93_v11 = vld [vmem:[#allocation6 + $0x30] sm:$0xff]  ;;  %v100_v14 = vld [vmem:[#allocation6 + $0x68] sm:$0xff]  ;;  %v98_v15 = vld [vmem:[#allocation6 + $0x58] sm:$0xff]  ;;  %s2967_s25 = scalar_lea.vmem %s1988_s24, 128  ;;  %p2972_p5 = scmp.lt.s32.totalorder %s1988_s24, %s1988_s24 }
  0x4e   :  { %2076 = vmatprep.subr.bf16.mxu0 %v2075_v4  ;;  %v2109_v13 = vpack.c.bf16 %v93_v11, %v89_v10  ;;  %v102_v16 = vld [vmem:[#allocation6 + $0x78] sm:$0xff]  ;;  %2108 = vmatprep.subr.bf16.mxu1 %v2107_v8  ;;  %v2079_v17 = vpack.c.bf16 %v100_v14, %v96_v12  ;;  %v95_v19 = vld [vmem:[#allocation6 + $0x40] sm:$0xff]  ;;  %v97_v21 = vld [vmem:[#allocation6 + $0x50] sm:$0xff]  ;;  %p2968_p4 = scmp.ne.s32.totalorder %s1988_s24, %s2967_s25  ;;  %p2973_p6 = scmp.lt.s32.totalorder %s2967_s25, %s2967_s25 }
  0x4f   :  { %2078 = vmatpush1.bf16.msra.mxu0 %v2077_v9  ;;  %v2111_v18 = vpack.c.bf16 %v102_v16, %v98_v15  ;;  %v99_v20 = vld [vmem:[#allocation6 + $0x60] sm:$0xff]  ;;  %v101_v23 = vld [vmem:[#allocation6 + $0x70] sm:$0xff]  ;;  %v104_v24 = vld [vmem:[#allocation6 + $0x88] sm:$0xff] }
  0x50   :  { %2110 = vmatpush1.bf16.msra.mxu1 %v2109_v13  ;;  %v2081_v22 = vpack.c.bf16 %v99_v20, %v95_v19  ;;  %v108_v25 = vld [vmem:[#allocation6 + $0xa8] sm:$0xff]  ;;  %2080 = vmatprep.subr.bf16.mxu0 %v2079_v17  ;;  %v2113_v26 = vpack.c.bf16 %v101_v23, %v97_v21  ;;  %v106_v28 = vld [vmem:[#allocation6 + $0x98] sm:$0xff]  ;;  %v103_v30 = vld [vmem:[#allocation6 + $0x80] sm:$0xff]  ;;  %p2974_p7 = por %p2973_p6, %p2972_p5 }
  0x51   :  { %2112 = vmatprep.subr.bf16.mxu1 %v2111_v18  ;;  %v2083_v27 = vpack.c.bf16 %v108_v25, %v104_v24  ;;  %v110_v29 = vld [vmem:[#allocation6 + $0xb8] sm:$0xff]  ;;  %v107_v32 = vld [vmem:[#allocation6 + $0xa0] sm:$0xff]  ;;  %v105_v33 = vld [vmem:[#allocation6 + $0x90] sm:$0xff] }
  0x52   :  { %v2115_v31 = vpack.c.bf16 %v110_v29, %v106_v28  ;;  %v109_v34 = vld [vmem:[#allocation6 + $0xb0] sm:$0xff]  ;;  %v2085_v35 = vpack.c.bf16 %v107_v32, %v103_v30  ;;  %v112_v36 = vld [vmem:[#allocation6 + $0xc8] sm:$0xff]  ;;  %v114_v38 = vld [vmem:[#allocation6 + $0xd8] sm:$0xff]  ;;  %p2975_p8 = pnand %p2974_p7, %p2968_p4 }
  0x53   :  { %2082 = vmatpush1.bf16.msra.mxu0 %v2081_v22  ;;  %v116_v37 = vld [vmem:[#allocation6 + $0xe8] sm:$0xff]  ;;  %v2117_v39 = vpack.c.bf16 %v109_v34, %v105_v33  ;;  %v118_v41 = vld [vmem:[#allocation6 + $0xf8] sm:$0xff]  ;;  %v111_v42 = vld [vmem:[#allocation6 + $0xc0] sm:$0xff] }
  0x54   :  { %2114 = vmatpush1.bf16.msra.mxu1 %v2113_v26  ;;  %2084 = vmatprep.subr.bf16.mxu0 %v2083_v27  ;;  %v2087_v40 = vpack.c.bf16 %v116_v37, %v112_v36  ;;  %v115_v43 = vld [vmem:[#allocation6 + $0xe0] sm:$0xff]  ;;  %v2119_v44 = vpack.c.bf16 %v118_v41, %v114_v38  ;;  %v113_v45 = vld [vmem:[#allocation6 + $0xd0] sm:$0xff]  ;;  %v120_v47 = vld [vmem:[#allocation6 + $0x108] sm:$0xff] }
  0x55   :  { %2116 = vmatprep.subr.bf16.mxu1 %v2115_v31  ;;  %v117_v46 = vld [vmem:[#allocation6 + $0xf0] sm:$0xff]  ;;  %v124_v48 = vld [vmem:[#allocation6 + $0x128] sm:$0xff]  ;;  %v122_v49 = vld [vmem:[#allocation6 + $0x118] sm:$0xff]  ;;  %v2089_v51 = vpack.c.bf16 %v115_v43, %v111_v42 }
  0x56   :  { %v126_v50 = vld [vmem:[#allocation6 + $0x138] sm:$0xff]  ;;  %v2121_v52 = vpack.c.bf16 %v117_v46, %v113_v45  ;;  %v2091_v53 = vpack.c.bf16 %v124_v48, %v120_v47  ;;  %v119_v54 = vld [vmem:[#allocation6 + $0x100] sm:$0xff]  ;;  %v121_v56 = vld [vmem:[#allocation6 + $0x110] sm:$0xff] }
  0x57   :  { %2086 = vmatpush1.bf16.msra.mxu0 %v2085_v35  ;;  %v123_v55 = vld [vmem:[#allocation6 + $0x120] sm:$0xff]  ;;  %v2123_v57 = vpack.c.bf16 %v126_v50, %v122_v49  ;;  %v125_v58 = vld [vmem:[#allocation6 + $0x130] sm:$0xff]  ;;  %v128_v59 = vld [vmem:[#allocation6 + $0x148] sm:$0xff] }
  0x58   :  { %2118 = vmatpush1.bf16.msra.mxu1 %v2117_v39  ;;  %2088 = vmatprep.subr.bf16.mxu0 %v2087_v40  ;;  %v132_v60 = vld [vmem:[#allocation6 + $0x168] sm:$0xff]  ;;  %v130_v61 = vld [vmem:[#allocation6 + $0x158] sm:$0xff]  ;;  %v2093_v63 = vpack.c.bf16 %v123_v55, %v119_v54  ;;  %v2125_v1 = vpack.c.bf16 %v125_v58, %v121_v56  ;;  %v127_v3 = vld [vmem:[#allocation6 + $0x140] sm:$0xff] }
  0x59   :  { %2120 = vmatprep.subr.bf16.mxu1 %v2119_v44  ;;  %v134_v62 = vld [vmem:[#allocation6 + $0x178] sm:$0xff]  ;;  %v2095_v2 = vpack.c.bf16 %v132_v60, %v128_v59  ;;  %v131_v4 = vld [vmem:[#allocation6 + $0x160] sm:$0xff]  ;;  %v129_v5 = vld [vmem:[#allocation6 + $0x150] sm:$0xff] }
  0x5a   :  { %v2127_v6 = vpack.c.bf16 %v134_v62, %v130_v61  ;;  %v133_v7 = vld [vmem:[#allocation6 + $0x170] sm:$0xff]  ;;  %v136_v8 = vld [vmem:[#allocation6 + $0x188] sm:$0xff]  ;;  %v138_v10 = vld [vmem:[#allocation6 + $0x198] sm:$0xff]  ;;  %v2097_v12 = vpack.c.bf16 %v131_v4, %v127_v3 }
  0x5b   :  { %2090 = vmatpush1.bf16.msra.mxu0 %v2089_v51  ;;  %v140_v9 = vld [vmem:[#allocation6 + $0x1a8] sm:$0xff]  ;;  %v142_v11 = vld [vmem:[#allocation6 + $0x1b8] sm:$0xff]  ;;  %v2129_v13 = vpack.c.bf16 %v133_v7, %v129_v5  ;;  %v135_v15 = vld [vmem:[#allocation6 + $0x180] sm:$0xff] }
  0x5c   :  { %2122 = vmatpush1.bf16.msra.mxu1 %v2121_v52  ;;  %2092 = vmatprep.subr.bf16.mxu0 %v2091_v53  ;;  %v2099_v14 = vpack.c.bf16 %v140_v9, %v136_v8  ;;  %v139_v16 = vld [vmem:[#allocation6 + $0x1a0] sm:$0xff]  ;;  %v137_v17 = vld [vmem:[#allocation6 + $0x190] sm:$0xff]  ;;  %v2131_v18 = vpack.c.bf16 %v142_v11, %v138_v10  ;;  %v144_v20 = vld [vmem:[#allocation6 + $0x1c8] sm:$0xff] }
  0x5d   :  { %2124 = vmatprep.subr.bf16.mxu1 %v2123_v57  ;;  %v141_v19 = vld [vmem:[#allocation6 + $0x1b0] sm:$0xff]  ;;  %v148_v21 = vld [vmem:[#allocation6 + $0x1e8] sm:$0xff]  ;;  %v146_v22 = vld [vmem:[#allocation6 + $0x1d8] sm:$0xff]  ;;  %v2101_v24 = vpack.c.bf16 %v139_v16, %v135_v15 }
  0x5e   :  { %v150_v23 = vld [vmem:[#allocation6 + $0x1f8] sm:$0xff]  ;;  %v2133_v25 = vpack.c.bf16 %v141_v19, %v137_v17  ;;  %v2103_v26 = vpack.c.bf16 %v148_v21, %v144_v20  ;;  %v143_v27 = vld [vmem:[#allocation6 + $0x1c0] sm:$0xff]  ;;  %v145_v29 = vld [vmem:[#allocation6 + $0x1d0] sm:$0xff] }
  0x5f   :  { %2094 = vmatpush1.bf16.msra.mxu0 %v2093_v63  ;;  %v147_v28 = vld [vmem:[#allocation6 + $0x1e0] sm:$0xff]  ;;  %v2135_v30 = vpack.c.bf16 %v150_v23, %v146_v22  ;;  %v149_v31 = vld [vmem:[#allocation6 + $0x1f0] sm:$0xff]  ;;  %v432_v32 = vld [vmem:[#allocation8 + $0x8] sm:$0xff] }
  0x60   :  { %2126 = vmatpush1.bf16.msra.mxu1 %v2125_v1  ;;  %2096 = vmatprep.subr.bf16.mxu0 %v2095_v2  ;;  %v436_v33 = vld [vmem:[#allocation8 + $0x28] sm:$0xff]  ;;  %v434_v34 = vld [vmem:[#allocation8 + $0x18] sm:$0xff]  ;;  %v2105_v36 = vpack.c.bf16 %v147_v28, %v143_v27  ;;  %v2137_v37 = vpack.c.bf16 %v149_v31, %v145_v29  ;;  %v431_v39 = vld [vmem:[#allocation8] sm:$0xff] }
  0x61   :  { %2128 = vmatprep.subr.bf16.mxu1 %v2127_v6  ;;  %v438_v35 = vld [vmem:[#allocation8 + $0x38] sm:$0xff]  ;;  %v3113_v38 = vpack.c.bf16 %v436_v33, %v432_v32  ;;  %v435_v40 = vld [vmem:[#allocation8 + $0x20] sm:$0xff]  ;;  %v433_v42 = vld [vmem:[#allocation8 + $0x10] sm:$0xff] }
  0x62   :  { %v3115_v41 = vpack.c.bf16 %v438_v35, %v434_v34  ;;  %v437_v43 = vld [vmem:[#allocation8 + $0x30] sm:$0xff]  ;;  %v440_v44 = vld [vmem:[#allocation8 + $0x48] sm:$0xff]  ;;  %v79_v46 = vld [vmem:[#allocation3] sm:$0xff]  ;;  %v3117_v47 = vpack.c.bf16 %v435_v40, %v431_v39 }
  0x63   :  { %2098 = vmatpush1.bf16.msra.mxu0 %v2097_v12  ;;  %v444_v45 = vld [vmem:[#allocation8 + $0x68] sm:$0xff]  ;;  %v442_v48 = vld [vmem:[#allocation8 + $0x58] sm:$0xff]  ;;  %v3120_v50 = vpack.c.bf16 %v437_v43, %v433_v42  ;;  %v439_v51 = vld [vmem:[#allocation8 + $0x40] sm:$0xff] }
  0x64   :  { %2130 = vmatpush1.bf16.msra.mxu1 %v2129_v13  ;;  %2100 = vmatprep.subr.bf16.mxu0 %v2099_v14  ;;  %v446_v49 = vld [vmem:[#allocation8 + $0x78] sm:$0xff]  ;;  %v443_v52 = vld [vmem:[#allocation8 + $0x60] sm:$0xff]  ;;  %v3123_v53 = vpack.c.bf16 %v444_v45, %v440_v44  ;;  %v441_v54 = vld [vmem:[#allocation8 + $0x50] sm:$0xff] }
  0x65   :  { %2132 = vmatprep.subr.bf16.mxu1 %v2131_v18  ;;  %v445_v55 = vld [vmem:[#allocation8 + $0x70] sm:$0xff]  ;;  %v3125_v56 = vpack.c.bf16 %v446_v49, %v442_v48  ;;  %v448_v57 = vld [vmem:[#allocation8 + $0x88] sm:$0xff]  ;;  %v3128_v60 = vpack.c.bf16 %v443_v52, %v439_v51  ;;  %v450_v61 = vld [vmem:[#allocation8 + $0x98] sm:$0xff] }
  0x66   :  { %v452_v58 = vld [vmem:[#allocation8 + $0xa8] sm:$0xff]  ;;  %v454_v62 = vld [vmem:[#allocation8 + $0xb8] sm:$0xff]  ;;  %v3132_v63 = vpack.c.bf16 %v445_v55, %v441_v54  ;;  %v447_v1 = vld [vmem:[#allocation8 + $0x80] sm:$0xff] }
  0x67   :  { %2102 = vmatpush1.bf16.msra.mxu0 %v2101_v24  ;;  %v80_v59 = vld [vmem:[#allocation3 + $0x8] sm:$0xff]  ;;  %v451_v2 = vld [vmem:[#allocation8 + $0xa0] sm:$0xff]  ;;  %v3136_v3 = vpack.c.bf16 %v452_v58, %v448_v57  ;;  %v449_v4 = vld [vmem:[#allocation8 + $0x90] sm:$0xff]  ;;  %v3139_v6 = vpack.c.bf16 %v454_v62, %v450_v61 }
  0x68   :  { %2134 = vmatpush1.bf16.msra.mxu1 %v2133_v25  ;;  %2104 = vmatprep.subr.bf16.mxu0 %v2103_v26  ;;  %v453_v5 = vld [vmem:[#allocation8 + $0xb0] sm:$0xff]  ;;  %v456_v7 = vld [vmem:[#allocation8 + $0xc8] sm:$0xff]  ;;  %v3142_v10 = vpack.c.bf16 %v451_v2, %v447_v1  ;;  %v458_v11 = vld [vmem:[#allocation8 + $0xd8] sm:$0xff] }
  0x69   :  { %2136 = vmatprep.subr.bf16.mxu1 %v2135_v30  ;;  %v460_v8 = vld [vmem:[#allocation8 + $0xe8] sm:$0xff]  ;;  %v81_v9 = vld [vmem:[#allocation3 + $0x10] sm:$0xff]  ;;  %v462_v12 = vld [vmem:[#allocation8 + $0xf8] sm:$0xff]  ;;  %v3146_v13 = vpack.c.bf16 %v453_v5, %v449_v4 }
  0x6a   :  { %v455_v14 = vld [vmem:[#allocation8 + $0xc0] sm:$0xff]  ;;  %v3150_v16 = vpack.c.bf16 %v460_v8, %v456_v7  ;;  %v457_v17 = vld [vmem:[#allocation8 + $0xd0] sm:$0xff]  ;;  %v3153_v19 = vpack.c.bf16 %v462_v12, %v458_v11  ;;  %v464_v20 = vld [vmem:[#allocation8 + $0x108] sm:$0xff] }
  0x6b   :  { %2106 = vmatpush1.bf16.msra.mxu0 %v2105_v36  ;;  %v459_v15 = vld [vmem:[#allocation8 + $0xe0] sm:$0xff]  ;;  %v461_v18 = vld [vmem:[#allocation8 + $0xf0] sm:$0xff]  ;;  %v468_v21 = vld [vmem:[#allocation8 + $0x128] sm:$0xff] }
  0x6c   :  { %2138 = vmatpush1.bf16.msra.mxu1 %v2137_v37  ;;  %2140 = vmatprep.subr.bf16.mxu0 %v3113_v38  ;;  %v82_v22 = vld [vmem:[#allocation3 + $0x18] sm:$0xff]  ;;  %v3156_v23 = vpack.c.bf16 %v459_v15, %v455_v14  ;;  %v3160_v26 = vpack.c.bf16 %v461_v18, %v457_v17  ;;  %v463_v27 = vld [vmem:[#allocation8 + $0x100] sm:$0xff]  ;;  %v3164_v29 = vpack.c.bf16 %v468_v21, %v464_v20  ;;  %v465_v30 = vld [vmem:[#allocation8 + $0x110] sm:$0xff] }
  0x6d   :  { %2172 = vmatprep.subr.bf16.mxu1 %v3115_v41  ;;  %v466_v24 = vld [vmem:[#allocation8 + $0x118] sm:$0xff]  ;;  %v467_v28 = vld [vmem:[#allocation8 + $0x120] sm:$0xff]  ;;  %v469_v31 = vld [vmem:[#allocation8 + $0x130] sm:$0xff] }
  0x6e   :  { %238 = vmatmul.mubr.f32.vlgmr.msra.gmra.mrb[0].mxu0 %v79_v46  ;;  %v470_v25 = vld [vmem:[#allocation8 + $0x138] sm:$0xff]  ;;  %v472_v33 = vld [vmem:[#allocation8 + $0x148] sm:$0xff]  ;;  %v83_v35 = vld [vmem:[#allocation3 + $0x20] sm:$0xff]  ;;  %v3170_v36 = vpack.c.bf16 %v467_v28, %v463_v27  ;;  %v3174_v40 = vpack.c.bf16 %v469_v31, %v465_v30  ;;  %v153_v28 = vlaneseq }
  0x6f   :  { %351 = vmatmul.mubr.f32.vlgmr.msra.gmra.mrb[0].mxu1 %v79_v46  ;;  %2142 = vmatpush1.bf16.msra.mxu0 %v3117_v47  ;;  %v3167_v32 = vpack.c.bf16 %v470_v25, %v466_v24  ;;  %v476_v34 = vld [vmem:[#allocation8 + $0x168] sm:$0xff]  ;;  %v474_v37 = vld [vmem:[#allocation8 + $0x158] sm:$0xff]  ;;  %v471_v42 = vld [vmem:[#allocation8 + $0x140] sm:$0xff] }
  0x70   :  { %2174 = vmatpush1.bf16.msra.mxu1 %v3120_v50  ;;  %243 = vmatprep.mubr.f32.mxu0 %v3005_v0  ;;  %v478_v39 = vld [vmem:[#allocation8 + $0x178] sm:$0xff]  ;;  %v475_v43 = vld [vmem:[#allocation8 + $0x160] sm:$0xff]  ;;  %v3178_v44 = vpack.c.bf16 %v476_v34, %v472_v33  ;;  %v473_v45 = vld [vmem:[#allocation8 + $0x150] sm:$0xff]  ;;  %v154_v30 = vshrl.u32 %v153_v28, 7 }
  0x71   :  { %356 = vmatprep.mubr.f32.mxu1 %v3005_v0  ;;  %2144 = vmatprep.subr.bf16.mxu0 %v3123_v53  ;;  %v477_v46 = vld [vmem:[#allocation8 + $0x170] sm:$0xff]  ;;  %v3181_v48 = vpack.c.bf16 %v478_v39, %v474_v37  ;;  %v480_v49 = vld [vmem:[#allocation8 + $0x188] sm:$0xff]  ;;  %v3184_v54 = vpack.c.bf16 %v475_v43, %v471_v42  ;;  %v482_v55 = vld [vmem:[#allocation8 + $0x198] sm:$0xff] }
  0x72   :  { %244 = vmatmul.mubr.f32.gmra.mrb[2].mxu0 %v80_v59  ;;  %2176 = vmatprep.subr.bf16.mxu1 %v3125_v56  ;;  %v484_v51 = vld [vmem:[#allocation8 + $0x1a8] sm:$0xff]  ;;  %v486_v57 = vld [vmem:[#allocation8 + $0x1b8] sm:$0xff]  ;;  %v3188_v58 = vpack.c.bf16 %v477_v46, %v473_v45  ;;  %v483_v61 = vld [vmem:[#allocation8 + $0x1a0] sm:$0xff]  ;;  %v155_v31 = vsub.s32 0, %v154_v30  ;;  %v159_v34 = vsub.s32 1, %v154_v30  ;;  %v167_v42 = vsub.s32 3, %v154_v30 }
  0x73   :  { %357 = vmatmul.mubr.f32.gmra.mrb[2].mxu1 %v80_v59  ;;  %2146 = vmatpush1.bf16.msra.mxu0 %v3128_v60  ;;  %v84_v52 = vld [vmem:[#allocation3 + $0x28] sm:$0xff]  ;;  %v479_v59 = vld [vmem:[#allocation8 + $0x180] sm:$0xff]  ;;  %v3192_v62 = vpack.c.bf16 %v484_v51, %v480_v49  ;;  %v481_v1 = vld [vmem:[#allocation8 + $0x190] sm:$0xff]  ;;  %v3195_v4 = vpack.c.bf16 %v486_v57, %v482_v55 }
  0x74   :  { %2178 = vmatpush1.bf16.msra.mxu1 %v3132_v63  ;;  %249 = vmatprep.mubr.f32.mxu0 %v3005_v0  ;;  %v485_v2 = vld [vmem:[#allocation8 + $0x1b0] sm:$0xff]  ;;  %v488_v5 = vld [vmem:[#allocation8 + $0x1c8] sm:$0xff]  ;;  %v490_v11 = vld [vmem:[#allocation8 + $0x1d8] sm:$0xff] }
  0x75   :  { %362 = vmatprep.mubr.f32.mxu1 %v3005_v0  ;;  %2148 = vmatprep.subr.bf16.mxu0 %v3136_v3  ;;  %v492_v7 = vld [vmem:[#allocation8 + $0x1e8] sm:$0xff]  ;;  %v85_v8 = vld [vmem:[#allocation3 + $0x30] sm:$0xff]  ;;  %v494_v12 = vld [vmem:[#allocation8 + $0x1f8] sm:$0xff]  ;;  %v3202_v14 = vpack.c.bf16 %v485_v2, %v481_v1 }
  0x76   :  { %250 = vmatmul.mubr.f32.gmra.mrb[4].mxu0 %v81_v9  ;;  %2180 = vmatprep.subr.bf16.mxu1 %v3139_v6  ;;  %v487_v15 = vld [vmem:[#allocation8 + $0x1c0] sm:$0xff]  ;;  %v3206_v18 = vpack.c.bf16 %v492_v7, %v488_v5  ;;  %v489_v20 = vld [vmem:[#allocation8 + $0x1d0] sm:$0xff]  ;;  %v86_v24 = vld [vmem:[#allocation3 + $0x38] sm:$0xff] }
  0x77   :  { %363 = vmatmul.mubr.f32.gmra.mrb[4].mxu1 %v81_v9  ;;  %2150 = vmatpush1.bf16.msra.mxu0 %v3142_v10  ;;  %v3198_v9 = vpack.c.bf16 %v483_v61, %v479_v59  ;;  %v491_v17 = vld [vmem:[#allocation8 + $0x1e0] sm:$0xff]  ;;  %v493_v21 = vld [vmem:[#allocation8 + $0x1f0] sm:$0xff]  ;;  %v163_v59 = vsub.s32 2, %v154_v30 }
  0x78   :  { %2182 = vmatpush1.bf16.msra.mxu1 %v3146_v13  ;;  %255 = vmatprep.mubr.f32.mxu0 %v3005_v0  ;;  %v3212_v25 = vpack.c.bf16 %v491_v17, %v487_v15  ;;  %v3216_v27 = vpack.c.bf16 %v493_v21, %v489_v20  ;;  %v151_v33 = vld [vmem:[%s3555_s3] sm:$0xf] }
  0x79   :  { %368 = vmatprep.mubr.f32.mxu1 %v3005_v0  ;;  %2152 = vmatprep.subr.bf16.mxu0 %v3150_v16  ;;  %v3268_v37 = vrot.slane %v151_v33, %v159_v34  ;;  %v3272_v57 = vrot.slane %v151_v33, %v167_v42  ;;  %v3275_v1 = vrot.slane %v151_v33, %v163_v59 }
  0x7a   :  { %256 = vmatmul.mubr.f32.gmra.mrb[6].mxu0 %v82_v22  ;;  %2184 = vmatprep.subr.bf16.mxu1 %v3153_v19 }
  0x7b   :  { %369 = vmatmul.mubr.f32.gmra.mrb[6].mxu1 %v82_v22  ;;  %2154 = vmatpush1.bf16.msra.mxu0 %v3156_v23  ;;  %v3209_v22 = vpack.c.bf16 %v494_v12, %v490_v11 }
  0x7c   :  { %2186 = vmatpush1.bf16.msra.mxu1 %v3160_v26  ;;  %261 = vmatprep.mubr.f32.mxu0 %v3005_v0 }
  0x7d   :  { %374 = vmatprep.mubr.f32.mxu1 %v3005_v0  ;;  %2156 = vmatprep.subr.bf16.mxu0 %v3164_v29 }
  0x7e   :  { %262 = vmatmul.mubr.f32.gmra.mrb[8].mxu0 %v83_v35  ;;  %2188 = vmatprep.subr.bf16.mxu1 %v3167_v32 }
  0x7f   :  { %375 = vmatmul.mubr.f32.gmra.mrb[8].mxu1 %v83_v35  ;;  %2158 = vmatpush1.bf16.msra.mxu0 %v3170_v36  ;;  %v3266_v35 = vrot.slane %v151_v33, %v155_v31 }
  0x80   :  { %2190 = vmatpush1.bf16.msra.mxu1 %v3174_v40  ;;  %267 = vmatprep.mubr.f32.mxu0 %v3005_v0 }
  0x81   :  { %380 = vmatprep.mubr.f32.mxu1 %v3005_v0  ;;  %2160 = vmatprep.subr.bf16.mxu0 %v3178_v44 }
  0x82   :  { %268 = vmatmul.mubr.f32.gmra.mrb[10].mxu0 %v84_v52  ;;  %2192 = vmatprep.subr.bf16.mxu1 %v3181_v48 }
  0x83   :  { %381 = vmatmul.mubr.f32.gmra.mrb[10].mxu1 %v84_v52  ;;  %2162 = vmatpush1.bf16.msra.mxu0 %v3184_v54 }
  0x84   :  { %2194 = vmatpush1.bf16.msra.mxu1 %v3188_v58  ;;  %273 = vmatprep.mubr.f32.mxu0 %v3005_v0 }
  0x85   :  { %386 = vmatprep.mubr.f32.mxu1 %v3005_v0  ;;  %2164 = vmatprep.subr.bf16.mxu0 %v3192_v62 }
  0x86   :  { %274 = vmatmul.mubr.f32.gmra.mrb[12].mxu0 %v85_v8  ;;  %2196 = vmatprep.subr.bf16.mxu1 %v3195_v4 }
  0x87   :  { %387 = vmatmul.mubr.f32.gmra.mrb[12].mxu1 %v85_v8  ;;  %2166 = vmatpush1.bf16.msra.mxu0 %v3198_v9 }
  0x88   :  { %2198 = vmatpush1.bf16.msra.mxu1 %v3202_v14  ;;  %279 = vmatprep.mubr.f32.mxu0 %v3005_v0 }
  0x89   :  { %392 = vmatprep.mubr.f32.mxu1 %v3005_v0  ;;  %2168 = vmatprep.subr.bf16.mxu0 %v3206_v18 }
  0x8a   :  { %280 = vmatmul.mubr.f32.gmra.mrb[14].mxu0 %v86_v24  ;;  %2200 = vmatprep.subr.bf16.mxu1 %v3209_v22 }
  0x8b   :  { %393 = vmatmul.mubr.f32.gmra.mrb[14].mxu1 %v86_v24  ;;  %2170 = vmatpush1.bf16.msra.mxu0 %v3212_v25 }
  0x8c   :  { %2202 = vmatpush1.bf16.msra.mxu1 %v3216_v27  ;;  %563 = vmatprep.mubr.f32.mxu0 %v3005_v0 }
  0x8d   :  { %634 = vmatprep.mubr.f32.mxu1 %v3005_v0  ;;  %2204 = vmatprep.subr.bf16.mxu0 %v3113_v38 }
  0x8e   :  { %564 = vmatmul.mubr.f32.vlgmr.msra.gmra.mrb[0].mxu0 %v3005_v0  ;;  %2236 = vmatprep.subr.bf16.mxu1 %v3115_v41 }
  0x8f   :  { %635 = vmatmul.mubr.f32.vlgmr.msra.gmra.mrb[0].mxu1 %v3005_v0  ;;  %2206 = vmatpush1.bf16.msra.mxu0 %v3117_v47 }
  0x90   :  { %2238 = vmatpush1.bf16.msra.mxu1 %v3120_v50  ;;  %2208 = vmatprep.subr.bf16.mxu0 %v3123_v53 }
  0x91   :  { %2240 = vmatprep.subr.bf16.mxu1 %v3125_v56  ;;  %737 = vmatprep.mubr.f32.mxu0 %v3005_v0 }
  0x92   :  { %808 = vmatprep.mubr.f32.mxu1 %v3005_v0 }
  0x93   :  { %2210 = vmatpush1.bf16.msra.mxu0 %v3128_v60 }
  0x94   :  { %2242 = vmatpush1.bf16.msra.mxu1 %v3132_v63  ;;  %2212 = vmatprep.subr.bf16.mxu0 %v3136_v3 }
  0x95   :  { %2244 = vmatprep.subr.bf16.mxu1 %v3139_v6 }
  0x97   :  { %2214 = vmatpush1.bf16.msra.mxu0 %v3142_v10 }
  0x98   :  { %2246 = vmatpush1.bf16.msra.mxu1 %v3146_v13  ;;  %2216 = vmatprep.subr.bf16.mxu0 %v3150_v16 }
  0x99   :  { %2248 = vmatprep.subr.bf16.mxu1 %v3153_v19 }
  0x9b   :  { %2218 = vmatpush1.bf16.msra.mxu0 %v3156_v23 }
  0x9c   :  { %2250 = vmatpush1.bf16.msra.mxu1 %v3160_v26  ;;  %2220 = vmatprep.subr.bf16.mxu0 %v3164_v29 }
  0x9d   :  { %2252 = vmatprep.subr.bf16.mxu1 %v3167_v32 }
  0x9f   :  { %2222 = vmatpush1.bf16.msra.mxu0 %v3170_v36 }
  0xa0   :  { %2254 = vmatpush1.bf16.msra.mxu1 %v3174_v40  ;;  %2224 = vmatprep.subr.bf16.mxu0 %v3178_v44 }
  0xa1   :  { %2256 = vmatprep.subr.bf16.mxu1 %v3181_v48 }
  0xa3   :  { %2226 = vmatpush1.bf16.msra.mxu0 %v3184_v54 }
  0xa4   :  { %2258 = vmatpush1.bf16.msra.mxu1 %v3188_v58  ;;  %2228 = vmatprep.subr.bf16.mxu0 %v3192_v62 }
  0xa5   :  { %2260 = vmatprep.subr.bf16.mxu1 %v3195_v4 }
  0xa7   :  { %2230 = vmatpush1.bf16.msra.mxu0 %v3198_v9 }
  0xa8   :  { %2262 = vmatpush1.bf16.msra.mxu1 %v3202_v14  ;;  %2232 = vmatprep.subr.bf16.mxu0 %v3206_v18 }
  0xa9   :  { %2264 = vmatprep.subr.bf16.mxu1 %v3209_v22 }
  0xab   :  { %2234 = vmatpush1.bf16.msra.mxu0 %v3212_v25 }
  0xac   :  { %2266 = vmatpush1.bf16.msra.mxu1 %v3216_v27  ;;  %2268 = vmatprep.subr.bf16.mxu0 %v3113_v38 }
  0xad   :  { %2300 = vmatprep.subr.bf16.mxu1 %v3115_v41 }
 0x161   :  { %v565_v39 = vpop.f32.mrb[0].mxu0 }
 0x162   :  { %v2675_v43 = vadd.f32 %v565_v39, %v3266_v35  ;;  %v636_v45 = vpop.f32.mrb[0].mxu1  ;;  %v567_v46 = vpop.f32.mrb[1].mxu0 }
 0x163   :  { %v2676_v49 = vadd.f32 %v567_v46, %v3268_v37  ;;  %v638_v51 = vpop.f32.mrb[1].mxu1  ;;  %v2691_v5 = vadd.f32 %v636_v45, %v3275_v1 }
 0x164   :  { %v1998_v52 = vmul.f32 -1.442695, %v2675_v43  ;;  %v2692_v61 = vadd.f32 %v638_v51, %v3272_v57 }
 0x165   :  { %v1999_v55 = vmul.f32 -1.442695, %v2676_v49 }
 0x166   :  { %2751 = vpow2.f32 %v1998_v52  ;;  %v2000_v2 = vmul.f32 -1.442695, %v2692_v61 }
 0x167   :  { %2753 = vpow2.f32 %v1999_v55 }
 0x168   :  { %2755 = vpow2.f32 %v2000_v2 }
 0x169   :  { %2757 = vtanh.f32 %v2691_v5 }
 0x170   :  { %v2752_v7 = vpop.eup %2751 }
 0x171   :  { %v2754_v8 = vpop.eup %2753  ;;  %v648_v11 = vadd.f32 1.0, %v2752_v7 }
 0x172   :  { %v654_v12 = vadd.f32 1.0, %v2754_v8  ;;  %v2756_v15 = vpop.eup %2755 }
 0x173   :  { %2759 = vrcp.f32 %v648_v11  ;;  %v2758_v17 = vpop.eup %2757  ;;  %v661_v28 = vadd.f32 1.0, %v2756_v15 }
 0x174   :  { %2761 = vrcp.f32 %v654_v12 }
 0x175   :  { %2763 = vrcp.f32 %v661_v28 }
 0x17d   :  { %v2760_v20 = vpop.eup %2759 }
 0x17e   :  { %v2762_v21 = vpop.eup %2761  ;;  %v665_v24 = vmul.f32 %v2760_v20, %v2758_v17 }
 0x17f   :  { %v664_v30 = vmul.f32 0.0, %v2762_v21  ;;  %v2764_v33 = vpop.eup %2763 }
 0x181   :  { %v3278_v31 = vadd.f32 %v665_v24, %v664_v30 }
 0x183   :  { %2765 = vtanh.f32 %v3278_v31 }
 0x18d   :  { %v2766_v34 = vpop.eup %2765 }
 0x18e   :  { %v668_v39 = vmul.f32 %v2766_v34, %v2764_v33 }
 0x190   :  { %738 = vmatmul.mubr.f32.vlgmr.msra.gmra.mrb[2].mxu0 %v668_v39  ;;  %809 = vmatmul.mubr.f32.vlgmr.msra.gmra.mrb[2].mxu1 %v668_v39 }
 0x191   :  { %2270 = vmatpush1.bf16.msra.mxu0 %v3117_v47  ;;  %2302 = vmatpush1.bf16.msra.mxu1 %v3120_v50 }
 0x192   :  { %2272 = vmatprep.subr.bf16.mxu0 %v3123_v53  ;;  %2304 = vmatprep.subr.bf16.mxu1 %v3125_v56 }
 0x193   :  { %911 = vmatprep.mubr.f32.mxu0 %v3005_v0  ;;  %982 = vmatprep.mubr.f32.mxu1 %v3005_v0 }
 0x195   :  { %2274 = vmatpush1.bf16.msra.mxu0 %v3128_v60  ;;  %2306 = vmatpush1.bf16.msra.mxu1 %v3132_v63 }
 0x196   :  { %2276 = vmatprep.subr.bf16.mxu0 %v3136_v3  ;;  %2308 = vmatprep.subr.bf16.mxu1 %v3139_v6 }
 0x199   :  { %2278 = vmatpush1.bf16.msra.mxu0 %v3142_v10  ;;  %2310 = vmatpush1.bf16.msra.mxu1 %v3146_v13 }
 0x19a   :  { %2280 = vmatprep.subr.bf16.mxu0 %v3150_v16  ;;  %2312 = vmatprep.subr.bf16.mxu1 %v3153_v19 }
 0x19d   :  { %2282 = vmatpush1.bf16.msra.mxu0 %v3156_v23  ;;  %2314 = vmatpush1.bf16.msra.mxu1 %v3160_v26 }
 0x19e   :  { %2284 = vmatprep.subr.bf16.mxu0 %v3164_v29  ;;  %2316 = vmatprep.subr.bf16.mxu1 %v3167_v32 }
 0x1a1   :  { %2286 = vmatpush1.bf16.msra.mxu0 %v3170_v36  ;;  %2318 = vmatpush1.bf16.msra.mxu1 %v3174_v40 }
 0x1a2   :  { %2288 = vmatprep.subr.bf16.mxu0 %v3178_v44  ;;  %2320 = vmatprep.subr.bf16.mxu1 %v3181_v48 }
 0x1a5   :  { %2290 = vmatpush1.bf16.msra.mxu0 %v3184_v54  ;;  %2322 = vmatpush1.bf16.msra.mxu1 %v3188_v58 }
 0x1a6   :  { %2292 = vmatprep.subr.bf16.mxu0 %v3192_v62  ;;  %2324 = vmatprep.subr.bf16.mxu1 %v3195_v4 }
 0x1a9   :  { %2294 = vmatpush1.bf16.msra.mxu0 %v3198_v9  ;;  %2326 = vmatpush1.bf16.msra.mxu1 %v3202_v14 }
 0x1aa   :  { %2296 = vmatprep.subr.bf16.mxu0 %v3206_v18  ;;  %2328 = vmatprep.subr.bf16.mxu1 %v3209_v22 }
 0x1ad   :  { %2298 = vmatpush1.bf16.msra.mxu0 %v3212_v25  ;;  %2330 = vmatpush1.bf16.msra.mxu1 %v3216_v27 }
 0x1ae   :  { %2332 = vmatprep.subr.bf16.mxu0 %v3113_v38  ;;  %2364 = vmatprep.subr.bf16.mxu1 %v3115_v41 }
 0x263   :  { %v739_v42 = vpop.f32.mrb[2].mxu0  ;;  %v810_v43 = vpop.f32.mrb[2].mxu1 }
 0x264   :  { %v2677_v45 = vadd.f32 %v739_v42, %v3266_v35  ;;  %v741_v46 = vpop.f32.mrb[3].mxu0  ;;  %v812_v49 = vpop.f32.mrb[3].mxu1  ;;  %v2693_v2 = vadd.f32 %v810_v43, %v3275_v1 }
 0x265   :  { %v2678_v51 = vadd.f32 %v741_v46, %v3268_v37  ;;  %v2694_v59 = vadd.f32 %v812_v49, %v3272_v57 }
 0x266   :  { %v2001_v52 = vmul.f32 -1.442695, %v2677_v45 }
 0x267   :  { %v2002_v55 = vmul.f32 -1.442695, %v2678_v51  ;;  %v2003_v61 = vmul.f32 -1.442695, %v2694_v59 }
 0x268   :  { %2767 = vpow2.f32 %v2001_v52 }
 0x269   :  { %2769 = vpow2.f32 %v2002_v55 }
 0x26a   :  { %2771 = vpow2.f32 %v2003_v61 }
 0x26b   :  { %2773 = vtanh.f32 %v2693_v2 }
 0x272   :  { %v2768_v5 = vpop.eup %2767 }
 0x273   :  { %v2770_v7 = vpop.eup %2769  ;;  %v822_v8 = vadd.f32 1.0, %v2768_v5 }
 0x274   :  { %v828_v11 = vadd.f32 1.0, %v2770_v7  ;;  %v2772_v12 = vpop.eup %2771 }
 0x275   :  { %2775 = vrcp.f32 %v822_v8  ;;  %v2774_v15 = vpop.eup %2773  ;;  %v835_v24 = vadd.f32 1.0, %v2772_v12 }
 0x276   :  { %2777 = vrcp.f32 %v828_v11 }
 0x277   :  { %2779 = vrcp.f32 %v835_v24 }
 0x27f   :  { %v2776_v17 = vpop.eup %2775 }
 0x280   :  { %v2778_v20 = vpop.eup %2777  ;;  %v839_v21 = vmul.f32 %v2776_v17, %v2774_v15 }
 0x281   :  { %v838_v28 = vmul.f32 %v2778_v20, %v3278_v31  ;;  %v2780_v33 = vpop.eup %2779 }
 0x283   :  { %v3320_v30 = vadd.f32 %v839_v21, %v838_v28 }
 0x285   :  { %2781 = vtanh.f32 %v3320_v30 }
 0x28f   :  { %v2782_v34 = vpop.eup %2781 }
 0x290   :  { %v842_v39 = vmul.f32 %v2782_v34, %v2780_v33 }
 0x292   :  { %912 = vmatmul.mubr.f32.vlgmr.msra.gmra.mrb[4].mxu0 %v842_v39  ;;  %983 = vmatmul.mubr.f32.vlgmr.msra.gmra.mrb[4].mxu1 %v842_v39 }
 0x293   :  { %2334 = vmatpush1.bf16.msra.mxu0 %v3117_v47  ;;  %2366 = vmatpush1.bf16.msra.mxu1 %v3120_v50 }
 0x294   :  { %2336 = vmatprep.subr.bf16.mxu0 %v3123_v53  ;;  %2368 = vmatprep.subr.bf16.mxu1 %v3125_v56 }
 0x295   :  { %1085 = vmatprep.mubr.f32.mxu0 %v3005_v0  ;;  %1156 = vmatprep.mubr.f32.mxu1 %v3005_v0 }
 0x297   :  { %2338 = vmatpush1.bf16.msra.mxu0 %v3128_v60  ;;  %2370 = vmatpush1.bf16.msra.mxu1 %v3132_v63 }
 0x298   :  { %2340 = vmatprep.subr.bf16.mxu0 %v3136_v3  ;;  %2372 = vmatprep.subr.bf16.mxu1 %v3139_v6 }
 0x29b   :  { %2342 = vmatpush1.bf16.msra.mxu0 %v3142_v10  ;;  %2374 = vmatpush1.bf16.msra.mxu1 %v3146_v13 }
 0x29c   :  { %2344 = vmatprep.subr.bf16.mxu0 %v3150_v16  ;;  %2376 = vmatprep.subr.bf16.mxu1 %v3153_v19 }
 0x29f   :  { %2346 = vmatpush1.bf16.msra.mxu0 %v3156_v23  ;;  %2378 = vmatpush1.bf16.msra.mxu1 %v3160_v26 }
 0x2a0   :  { %2348 = vmatprep.subr.bf16.mxu0 %v3164_v29  ;;  %2380 = vmatprep.subr.bf16.mxu1 %v3167_v32 }
 0x2a3   :  { %2350 = vmatpush1.bf16.msra.mxu0 %v3170_v36  ;;  %2382 = vmatpush1.bf16.msra.mxu1 %v3174_v40 }
 0x2a4   :  { %2352 = vmatprep.subr.bf16.mxu0 %v3178_v44  ;;  %2384 = vmatprep.subr.bf16.mxu1 %v3181_v48 }
 0x2a7   :  { %2354 = vmatpush1.bf16.msra.mxu0 %v3184_v54  ;;  %2386 = vmatpush1.bf16.msra.mxu1 %v3188_v58 }
 0x2a8   :  { %2356 = vmatprep.subr.bf16.mxu0 %v3192_v62  ;;  %2388 = vmatprep.subr.bf16.mxu1 %v3195_v4 }
 0x2ab   :  { %2358 = vmatpush1.bf16.msra.mxu0 %v3198_v9  ;;  %2390 = vmatpush1.bf16.msra.mxu1 %v3202_v14 }
 0x2ac   :  { %2360 = vmatprep.subr.bf16.mxu0 %v3206_v18  ;;  %2392 = vmatprep.subr.bf16.mxu1 %v3209_v22 }
 0x2af   :  { %2362 = vmatpush1.bf16.msra.mxu0 %v3212_v25  ;;  %2394 = vmatpush1.bf16.msra.mxu1 %v3216_v27 }
 0x2b0   :  { %2396 = vmatprep.subr.bf16.mxu0 %v3113_v38  ;;  %2428 = vmatprep.subr.bf16.mxu1 %v3115_v41 }
 0x365   :  { %v913_v31 = vpop.f32.mrb[4].mxu0  ;;  %v984_v42 = vpop.f32.mrb[4].mxu1 }
 0x366   :  { %v2679_v43 = vadd.f32 %v913_v31, %v3266_v35  ;;  %v915_v45 = vpop.f32.mrb[5].mxu0  ;;  %v986_v46 = vpop.f32.mrb[5].mxu1  ;;  %v2695_v61 = vadd.f32 %v984_v42, %v3275_v1 }
 0x367   :  { %v2680_v49 = vadd.f32 %v915_v45, %v3268_v37  ;;  %v2696_v55 = vadd.f32 %v986_v46, %v3272_v57 }
 0x368   :  { %v2004_v51 = vmul.f32 -1.442695, %v2679_v43 }
 0x369   :  { %v2005_v52 = vmul.f32 -1.442695, %v2680_v49  ;;  %v2006_v59 = vmul.f32 -1.442695, %v2696_v55 }
 0x36a   :  { %2783 = vpow2.f32 %v2004_v51 }
 0x36b   :  { %2785 = vpow2.f32 %v2005_v52 }
 0x36c   :  { %2787 = vpow2.f32 %v2006_v59 }
 0x36d   :  { %2789 = vtanh.f32 %v2695_v61 }
 0x374   :  { %v2784_v2 = vpop.eup %2783 }
 0x375   :  { %v2786_v5 = vpop.eup %2785  ;;  %v996_v7 = vadd.f32 1.0, %v2784_v2 }
 0x376   :  { %v1002_v8 = vadd.f32 1.0, %v2786_v5  ;;  %v2788_v11 = vpop.eup %2787 }
 0x377   :  { %2791 = vrcp.f32 %v996_v7  ;;  %v2790_v12 = vpop.eup %2789  ;;  %v1009_v21 = vadd.f32 1.0, %v2788_v11 }
 0x378   :  { %2793 = vrcp.f32 %v1002_v8 }
 0x379   :  { %2795 = vrcp.f32 %v1009_v21 }
 0x381   :  { %v2792_v15 = vpop.eup %2791 }
 0x382   :  { %v2794_v17 = vpop.eup %2793  ;;  %v1013_v20 = vmul.f32 %v2792_v15, %v2790_v12 }
 0x383   :  { %v1012_v24 = vmul.f32 %v2794_v17, %v3320_v30  ;;  %v2796_v33 = vpop.eup %2795 }
 0x385   :  { %v3362_v28 = vadd.f32 %v1013_v20, %v1012_v24 }
 0x387   :  { %2797 = vtanh.f32 %v3362_v28 }
 0x391   :  { %v2798_v34 = vpop.eup %2797 }
 0x392   :  { %v1016_v39 = vmul.f32 %v2798_v34, %v2796_v33 }
 0x394   :  { %1086 = vmatmul.mubr.f32.vlgmr.msra.gmra.mrb[6].mxu0 %v1016_v39  ;;  %1157 = vmatmul.mubr.f32.vlgmr.msra.gmra.mrb[6].mxu1 %v1016_v39 }
 0x395   :  { %2398 = vmatpush1.bf16.msra.mxu0 %v3117_v47  ;;  %2430 = vmatpush1.bf16.msra.mxu1 %v3120_v50 }
 0x396   :  { %2400 = vmatprep.subr.bf16.mxu0 %v3123_v53  ;;  %2432 = vmatprep.subr.bf16.mxu1 %v3125_v56 }
 0x397   :  { %1259 = vmatprep.mubr.f32.mxu0 %v3005_v0  ;;  %1330 = vmatprep.mubr.f32.mxu1 %v3005_v0 }
 0x399   :  { %2402 = vmatpush1.bf16.msra.mxu0 %v3128_v60  ;;  %2434 = vmatpush1.bf16.msra.mxu1 %v3132_v63 }
 0x39a   :  { %2404 = vmatprep.subr.bf16.mxu0 %v3136_v3  ;;  %2436 = vmatprep.subr.bf16.mxu1 %v3139_v6 }
 0x39d   :  { %2406 = vmatpush1.bf16.msra.mxu0 %v3142_v10  ;;  %2438 = vmatpush1.bf16.msra.mxu1 %v3146_v13 }
 0x39e   :  { %2408 = vmatprep.subr.bf16.mxu0 %v3150_v16  ;;  %2440 = vmatprep.subr.bf16.mxu1 %v3153_v19 }
 0x3a1   :  { %2410 = vmatpush1.bf16.msra.mxu0 %v3156_v23  ;;  %2442 = vmatpush1.bf16.msra.mxu1 %v3160_v26 }
 0x3a2   :  { %2412 = vmatprep.subr.bf16.mxu0 %v3164_v29  ;;  %2444 = vmatprep.subr.bf16.mxu1 %v3167_v32 }
 0x3a5   :  { %2414 = vmatpush1.bf16.msra.mxu0 %v3170_v36  ;;  %2446 = vmatpush1.bf16.msra.mxu1 %v3174_v40 }
 0x3a6   :  { %2416 = vmatprep.subr.bf16.mxu0 %v3178_v44  ;;  %2448 = vmatprep.subr.bf16.mxu1 %v3181_v48 }
 0x3a9   :  { %2418 = vmatpush1.bf16.msra.mxu0 %v3184_v54  ;;  %2450 = vmatpush1.bf16.msra.mxu1 %v3188_v58 }
 0x3aa   :  { %2420 = vmatprep.subr.bf16.mxu0 %v3192_v62  ;;  %2452 = vmatprep.subr.bf16.mxu1 %v3195_v4 }
 0x3ad   :  { %2422 = vmatpush1.bf16.msra.mxu0 %v3198_v9  ;;  %2454 = vmatpush1.bf16.msra.mxu1 %v3202_v14 }
 0x3ae   :  { %2424 = vmatprep.subr.bf16.mxu0 %v3206_v18  ;;  %2456 = vmatprep.subr.bf16.mxu1 %v3209_v22 }
 0x3b1   :  { %2426 = vmatpush1.bf16.msra.mxu0 %v3212_v25  ;;  %2458 = vmatpush1.bf16.msra.mxu1 %v3216_v27 }
 0x3b2   :  { %2460 = vmatprep.subr.bf16.mxu0 %v3113_v38  ;;  %2492 = vmatprep.subr.bf16.mxu1 %v3115_v41 }
 0x467   :  { %v1087_v30 = vpop.f32.mrb[6].mxu0  ;;  %v1158_v31 = vpop.f32.mrb[6].mxu1 }
 0x468   :  { %v2681_v42 = vadd.f32 %v1087_v30, %v3266_v35  ;;  %v1089_v43 = vpop.f32.mrb[7].mxu0  ;;  %v1160_v45 = vpop.f32.mrb[7].mxu1  ;;  %v2697_v59 = vadd.f32 %v1158_v31, %v3275_v1 }
 0x469   :  { %v2682_v46 = vadd.f32 %v1089_v43, %v3268_v37  ;;  %v2698_v52 = vadd.f32 %v1160_v45, %v3272_v57 }
 0x46a   :  { %v2007_v49 = vmul.f32 -1.442695, %v2681_v42 }
 0x46b   :  { %v2008_v51 = vmul.f32 -1.442695, %v2682_v46  ;;  %v2009_v55 = vmul.f32 -1.442695, %v2698_v52 }
 0x46c   :  { %2799 = vpow2.f32 %v2007_v49 }
 0x46d   :  { %2801 = vpow2.f32 %v2008_v51 }
 0x46e   :  { %2803 = vpow2.f32 %v2009_v55 }
 0x46f   :  { %2805 = vtanh.f32 %v2697_v59 }
 0x476   :  { %v2800_v61 = vpop.eup %2799 }
 0x477   :  { %v2802_v2 = vpop.eup %2801  ;;  %v1170_v5 = vadd.f32 1.0, %v2800_v61 }
 0x478   :  { %v1176_v7 = vadd.f32 1.0, %v2802_v2  ;;  %v2804_v8 = vpop.eup %2803 }
 0x479   :  { %2807 = vrcp.f32 %v1170_v5  ;;  %v2806_v11 = vpop.eup %2805  ;;  %v1183_v20 = vadd.f32 1.0, %v2804_v8 }
 0x47a   :  { %2809 = vrcp.f32 %v1176_v7 }
 0x47b   :  { %2811 = vrcp.f32 %v1183_v20 }
 0x483   :  { %v2808_v12 = vpop.eup %2807 }
 0x484   :  { %v2810_v15 = vpop.eup %2809  ;;  %v1187_v17 = vmul.f32 %v2808_v12, %v2806_v11 }
 0x485   :  { %v1186_v21 = vmul.f32 %v2810_v15, %v3362_v28  ;;  %v2812_v33 = vpop.eup %2811 }
 0x487   :  { %v3404_v24 = vadd.f32 %v1187_v17, %v1186_v21 }
 0x489   :  { %2813 = vtanh.f32 %v3404_v24 }
 0x493   :  { %v2814_v34 = vpop.eup %2813 }
 0x494   :  { %v1190_v39 = vmul.f32 %v2814_v34, %v2812_v33 }
 0x496   :  { %1260 = vmatmul.mubr.f32.vlgmr.msra.gmra.mrb[8].mxu0 %v1190_v39  ;;  %1331 = vmatmul.mubr.f32.vlgmr.msra.gmra.mrb[8].mxu1 %v1190_v39 }
 0x497   :  { %2462 = vmatpush1.bf16.msra.mxu0 %v3117_v47  ;;  %2494 = vmatpush1.bf16.msra.mxu1 %v3120_v50 }
 0x498   :  { %2464 = vmatprep.subr.bf16.mxu0 %v3123_v53  ;;  %2496 = vmatprep.subr.bf16.mxu1 %v3125_v56 }
 0x499   :  { %1433 = vmatprep.mubr.f32.mxu0 %v3005_v0  ;;  %1504 = vmatprep.mubr.f32.mxu1 %v3005_v0 }
 0x49b   :  { %2466 = vmatpush1.bf16.msra.mxu0 %v3128_v60  ;;  %2498 = vmatpush1.bf16.msra.mxu1 %v3132_v63 }
 0x49c   :  { %2468 = vmatprep.subr.bf16.mxu0 %v3136_v3  ;;  %2500 = vmatprep.subr.bf16.mxu1 %v3139_v6 }
 0x49f   :  { %2470 = vmatpush1.bf16.msra.mxu0 %v3142_v10  ;;  %2502 = vmatpush1.bf16.msra.mxu1 %v3146_v13 }
 0x4a0   :  { %2472 = vmatprep.subr.bf16.mxu0 %v3150_v16  ;;  %2504 = vmatprep.subr.bf16.mxu1 %v3153_v19 }
 0x4a3   :  { %2474 = vmatpush1.bf16.msra.mxu0 %v3156_v23  ;;  %2506 = vmatpush1.bf16.msra.mxu1 %v3160_v26 }
 0x4a4   :  { %2476 = vmatprep.subr.bf16.mxu0 %v3164_v29  ;;  %2508 = vmatprep.subr.bf16.mxu1 %v3167_v32 }
 0x4a7   :  { %2478 = vmatpush1.bf16.msra.mxu0 %v3170_v36  ;;  %2510 = vmatpush1.bf16.msra.mxu1 %v3174_v40 }
 0x4a8   :  { %2480 = vmatprep.subr.bf16.mxu0 %v3178_v44  ;;  %2512 = vmatprep.subr.bf16.mxu1 %v3181_v48 }
 0x4ab   :  { %2482 = vmatpush1.bf16.msra.mxu0 %v3184_v54  ;;  %2514 = vmatpush1.bf16.msra.mxu1 %v3188_v58 }
 0x4ac   :  { %2484 = vmatprep.subr.bf16.mxu0 %v3192_v62  ;;  %2516 = vmatprep.subr.bf16.mxu1 %v3195_v4 }
 0x4af   :  { %2486 = vmatpush1.bf16.msra.mxu0 %v3198_v9  ;;  %2518 = vmatpush1.bf16.msra.mxu1 %v3202_v14 }
 0x4b0   :  { %2488 = vmatprep.subr.bf16.mxu0 %v3206_v18  ;;  %2520 = vmatprep.subr.bf16.mxu1 %v3209_v22 }
 0x4b3   :  { %2490 = vmatpush1.bf16.msra.mxu0 %v3212_v25  ;;  %2522 = vmatpush1.bf16.msra.mxu1 %v3216_v27 }
 0x4b4   :  { %2524 = vmatprep.subr.bf16.mxu0 %v3113_v38  ;;  %2556 = vmatprep.subr.bf16.mxu1 %v3115_v41 }
 0x569   :  { %v1261_v28 = vpop.f32.mrb[8].mxu0  ;;  %v1332_v30 = vpop.f32.mrb[8].mxu1 }
 0x56a   :  { %v2683_v31 = vadd.f32 %v1261_v28, %v3266_v35  ;;  %v1263_v42 = vpop.f32.mrb[9].mxu0  ;;  %v1334_v43 = vpop.f32.mrb[9].mxu1  ;;  %v2699_v55 = vadd.f32 %v1332_v30, %v3275_v1 }
 0x56b   :  { %v2684_v45 = vadd.f32 %v1263_v42, %v3268_v37  ;;  %v2700_v51 = vadd.f32 %v1334_v43, %v3272_v57 }
 0x56c   :  { %v2010_v46 = vmul.f32 -1.442695, %v2683_v31 }
 0x56d   :  { %v2011_v49 = vmul.f32 -1.442695, %v2684_v45  ;;  %v2012_v52 = vmul.f32 -1.442695, %v2700_v51 }
 0x56e   :  { %2815 = vpow2.f32 %v2010_v46 }
 0x56f   :  { %2817 = vpow2.f32 %v2011_v49 }
 0x570   :  { %2819 = vpow2.f32 %v2012_v52 }
 0x571   :  { %2821 = vtanh.f32 %v2699_v55 }
 0x578   :  { %v2816_v59 = vpop.eup %2815 }
 0x579   :  { %v2818_v61 = vpop.eup %2817  ;;  %v1344_v2 = vadd.f32 1.0, %v2816_v59 }
 0x57a   :  { %v1350_v5 = vadd.f32 1.0, %v2818_v61  ;;  %v2820_v7 = vpop.eup %2819 }
 0x57b   :  { %2823 = vrcp.f32 %v1344_v2  ;;  %v2822_v8 = vpop.eup %2821  ;;  %v1357_v17 = vadd.f32 1.0, %v2820_v7 }
 0x57c   :  { %2825 = vrcp.f32 %v1350_v5 }
 0x57d   :  { %2827 = vrcp.f32 %v1357_v17 }
 0x585   :  { %v2824_v11 = vpop.eup %2823 }
 0x586   :  { %v2826_v12 = vpop.eup %2825  ;;  %v1361_v15 = vmul.f32 %v2824_v11, %v2822_v8 }
 0x587   :  { %v1360_v20 = vmul.f32 %v2826_v12, %v3404_v24  ;;  %v2828_v33 = vpop.eup %2827 }
 0x589   :  { %v3446_v21 = vadd.f32 %v1361_v15, %v1360_v20 }
 0x58b   :  { %2829 = vtanh.f32 %v3446_v21 }
 0x595   :  { %v2830_v34 = vpop.eup %2829 }
 0x596   :  { %v1364_v39 = vmul.f32 %v2830_v34, %v2828_v33  ;;  %v1890_v34 = vld [vmem:[#allocation9 + $0x18] sm:$0xff] }
 0x598   :  { %1434 = vmatmul.mubr.f32.vlgmr.msra.gmra.mrb[10].mxu0 %v1364_v39  ;;  %1505 = vmatmul.mubr.f32.vlgmr.msra.gmra.mrb[10].mxu1 %v1364_v39 }
 0x599   :  { %2526 = vmatpush1.bf16.msra.mxu0 %v3117_v47  ;;  %2558 = vmatpush1.bf16.msra.mxu1 %v3120_v50 }
 0x59a   :  { %2528 = vmatprep.subr.bf16.mxu0 %v3123_v53  ;;  %2560 = vmatprep.subr.bf16.mxu1 %v3125_v56 }
 0x59b   :  { %1607 = vmatprep.mubr.f32.mxu0 %v3005_v0  ;;  %1678 = vmatprep.mubr.f32.mxu1 %v3005_v0 }
 0x59d   :  { %2530 = vmatpush1.bf16.msra.mxu0 %v3128_v60  ;;  %2562 = vmatpush1.bf16.msra.mxu1 %v3132_v63 }
 0x59e   :  { %2532 = vmatprep.subr.bf16.mxu0 %v3136_v3  ;;  %2564 = vmatprep.subr.bf16.mxu1 %v3139_v6 }
 0x5a1   :  { %2534 = vmatpush1.bf16.msra.mxu0 %v3142_v10  ;;  %2566 = vmatpush1.bf16.msra.mxu1 %v3146_v13 }
 0x5a2   :  { %2536 = vmatprep.subr.bf16.mxu0 %v3150_v16  ;;  %2568 = vmatprep.subr.bf16.mxu1 %v3153_v19 }
 0x5a5   :  { %2538 = vmatpush1.bf16.msra.mxu0 %v3156_v23  ;;  %2570 = vmatpush1.bf16.msra.mxu1 %v3160_v26 }
 0x5a6   :  { %2540 = vmatprep.subr.bf16.mxu0 %v3164_v29  ;;  %2572 = vmatprep.subr.bf16.mxu1 %v3167_v32 }
 0x5a9   :  { %2542 = vmatpush1.bf16.msra.mxu0 %v3170_v36  ;;  %2574 = vmatpush1.bf16.msra.mxu1 %v3174_v40 }
 0x5aa   :  { %2544 = vmatprep.subr.bf16.mxu0 %v3178_v44  ;;  %2576 = vmatprep.subr.bf16.mxu1 %v3181_v48 }
 0x5ad   :  { %2546 = vmatpush1.bf16.msra.mxu0 %v3184_v54  ;;  %2578 = vmatpush1.bf16.msra.mxu1 %v3188_v58 }
 0x5ae   :  { %2548 = vmatprep.subr.bf16.mxu0 %v3192_v62  ;;  %2580 = vmatprep.subr.bf16.mxu1 %v3195_v4 }
 0x5b1   :  { %2550 = vmatpush1.bf16.msra.mxu0 %v3198_v9  ;;  %2582 = vmatpush1.bf16.msra.mxu1 %v3202_v14 }
 0x5b2   :  { %2552 = vmatprep.subr.bf16.mxu0 %v3206_v18  ;;  %2584 = vmatprep.subr.bf16.mxu1 %v3209_v22 }
 0x5b5   :  { %2554 = vmatpush1.bf16.msra.mxu0 %v3212_v25  ;;  %2586 = vmatpush1.bf16.msra.mxu1 %v3216_v27 }
 0x5b6   :  { %2588 = vmatprep.subr.bf16.mxu0 %v3113_v38  ;;  %2620 = vmatprep.subr.bf16.mxu1 %v3115_v41 }
 0x66b   :  { %v1435_v24 = vpop.f32.mrb[10].mxu0  ;;  %v1506_v28 = vpop.f32.mrb[10].mxu1 }
 0x66c   :  { %v2685_v30 = vadd.f32 %v1435_v24, %v3266_v35  ;;  %v1437_v31 = vpop.f32.mrb[11].mxu0  ;;  %v1508_v42 = vpop.f32.mrb[11].mxu1  ;;  %v2701_v52 = vadd.f32 %v1506_v28, %v3275_v1  ;;  %v1891_v24 = vld [vmem:[#allocation9 + $0x20] sm:$0xff]  ;;  %v1892_v28 = vld [vmem:[#allocation9 + $0x28] sm:$0xff] }
 0x66d   :  { %v2686_v43 = vadd.f32 %v1437_v31, %v3268_v37  ;;  %v2702_v49 = vadd.f32 %v1508_v42, %v3272_v57  ;;  %v1893_v31 = vld [vmem:[#allocation9 + $0x30] sm:$0xff]  ;;  %v1894_v42 = vld [vmem:[#allocation9 + $0x38] sm:$0xff] }
 0x66e   :  { %v2013_v45 = vmul.f32 -1.442695, %v2685_v30  ;;  %v2658_v30 = vpack.c.bf16 %v1892_v28, %v1891_v24 }
 0x66f   :  { %v2014_v46 = vmul.f32 -1.442695, %v2686_v43  ;;  %v2015_v51 = vmul.f32 -1.442695, %v2702_v49  ;;  %v2661_v43 = vpack.c.bf16 %v1894_v42, %v1893_v31 }
 0x670   :  { %2831 = vpow2.f32 %v2013_v45  ;;  %v1895_v45 = vld [vmem:[#allocation9 + $0x40] sm:$0xff] }
 0x671   :  { %2833 = vpow2.f32 %v2014_v46  ;;  %v1896_v46 = vld [vmem:[#allocation9 + $0x48] sm:$0xff] }
 0x672   :  { %2835 = vpow2.f32 %v2015_v51  ;;  %v2664_v49 = vpack.c.bf16 %v1896_v46, %v1895_v45  ;;  %v1897_v51 = vld [vmem:[#allocation9 + $0x50] sm:$0xff] }
 0x673   :  { %2837 = vtanh.f32 %v2701_v52  ;;  %v1898_v52 = vld [vmem:[#allocation9 + $0x58] sm:$0xff] }
 0x67a   :  { %v2832_v38 = vpop.eup %2831 }
 0x67b   :  { %v2834_v55 = vpop.eup %2833  ;;  %v1518_v41 = vadd.f32 1.0, %v2832_v38  ;;  %v1899_v38 = vld [vmem:[#allocation9 + $0x60] sm:$0xff] }
 0x67c   :  { %v1524_v59 = vadd.f32 1.0, %v2834_v55  ;;  %v2836_v61 = vpop.eup %2835  ;;  %v2667_v55 = vpack.c.bf16 %v1898_v52, %v1897_v51 }
 0x67d   :  { %2839 = vrcp.f32 %v1518_v41  ;;  %v2838_v2 = vpop.eup %2837  ;;  %v1531_v11 = vadd.f32 1.0, %v2836_v61  ;;  %v1900_v41 = vld [vmem:[#allocation9 + $0x68] sm:$0xff]  ;;  %v1901_v61 = vld [vmem:[#allocation9 + $0x70] sm:$0xff] }
 0x67e   :  { %2841 = vrcp.f32 %v1524_v59  ;;  %v2670_v59 = vpack.c.bf16 %v1900_v41, %v1899_v38 }
 0x67f   :  { %2843 = vrcp.f32 %v1531_v11 }
 0x687   :  { %v2840_v5 = vpop.eup %2839 }
 0x688   :  { %v2842_v7 = vpop.eup %2841  ;;  %v1535_v8 = vmul.f32 %v2840_v5, %v2838_v2  ;;  %v1902_v2 = vld [vmem:[#allocation9 + $0x78] sm:$0xff] }
 0x689   :  { %v1534_v12 = vmul.f32 %v2842_v7, %v3446_v21  ;;  %v2844_v17 = vpop.eup %2843  ;;  %v1889_v21 = vld [vmem:[#allocation9 + $0x10] sm:$0xff]  ;;  %v2673_v5 = vpack.c.bf16 %v1902_v2, %v1901_v61 }
 0x68a   :  { %v2655_v39 = vpack.c.bf16 %v1890_v34, %v1889_v21 }
 0x68b   :  { %v3488_v15 = vadd.f32 %v1535_v8, %v1534_v12 }
 0x68d   :  { %2845 = vtanh.f32 %v3488_v15 }
 0x697   :  { %v2846_v20 = vpop.eup %2845 }
 0x698   :  { %v1538_v33 = vmul.f32 %v2846_v20, %v2844_v17 }
 0x69a   :  { %1608 = vmatmul.mubr.f32.vlgmr.msra.gmra.mrb[12].mxu0 %v1538_v33  ;;  %1679 = vmatmul.mubr.f32.vlgmr.msra.gmra.mrb[12].mxu1 %v1538_v33 }
 0x69b   :  { %2590 = vmatpush1.bf16.msra.mxu0 %v3117_v47  ;;  %2622 = vmatpush1.bf16.msra.mxu1 %v3120_v50 }
 0x69c   :  { %2592 = vmatprep.subr.bf16.mxu0 %v3123_v53  ;;  %2624 = vmatprep.subr.bf16.mxu1 %v3125_v56 }
 0x69d   :  { %1781 = vmatprep.mubr.f32.mxu0 %v3005_v0  ;;  %1852 = vmatprep.mubr.f32.mxu1 %v3005_v0 }
 0x69f   :  { %2594 = vmatpush1.bf16.msra.mxu0 %v3128_v60  ;;  %2626 = vmatpush1.bf16.msra.mxu1 %v3132_v63 }
 0x6a0   :  { %2596 = vmatprep.subr.bf16.mxu0 %v3136_v3  ;;  %2628 = vmatprep.subr.bf16.mxu1 %v3139_v6 }
 0x6a3   :  { %2598 = vmatpush1.bf16.msra.mxu0 %v3142_v10  ;;  %2630 = vmatpush1.bf16.msra.mxu1 %v3146_v13 }
 0x6a4   :  { %2600 = vmatprep.subr.bf16.mxu0 %v3150_v16  ;;  %2632 = vmatprep.subr.bf16.mxu1 %v3153_v19 }
 0x6a7   :  { %2602 = vmatpush1.bf16.msra.mxu0 %v3156_v23  ;;  %2634 = vmatpush1.bf16.msra.mxu1 %v3160_v26 }
 0x6a8   :  { %2604 = vmatprep.subr.bf16.mxu0 %v3164_v29  ;;  %2636 = vmatprep.subr.bf16.mxu1 %v3167_v32 }
 0x6ab   :  { %2606 = vmatpush1.bf16.msra.mxu0 %v3170_v36  ;;  %2638 = vmatpush1.bf16.msra.mxu1 %v3174_v40 }
 0x6ac   :  { %2608 = vmatprep.subr.bf16.mxu0 %v3178_v44  ;;  %2640 = vmatprep.subr.bf16.mxu1 %v3181_v48 }
 0x6af   :  { %2610 = vmatpush1.bf16.msra.mxu0 %v3184_v54  ;;  %2642 = vmatpush1.bf16.msra.mxu1 %v3188_v58 }
 0x6b0   :  { %2612 = vmatprep.subr.bf16.mxu0 %v3192_v62  ;;  %2644 = vmatprep.subr.bf16.mxu1 %v3195_v4 }
 0x6b3   :  { %2614 = vmatpush1.bf16.msra.mxu0 %v3198_v9  ;;  %2646 = vmatpush1.bf16.msra.mxu1 %v3202_v14 }
 0x6b4   :  { %2616 = vmatprep.subr.bf16.mxu0 %v3206_v18  ;;  %2648 = vmatprep.subr.bf16.mxu1 %v3209_v22  ;;  %v1887_v18 = vld [vmem:[#allocation9] sm:$0xff]  ;;  %v1888_v22 = vld [vmem:[#allocation9 + $0x8] sm:$0xff] }
 0x6b7   :  { %2618 = vmatpush1.bf16.msra.mxu0 %v3212_v25  ;;  %2650 = vmatpush1.bf16.msra.mxu1 %v3216_v27  ;;  %v2652_v25 = vpack.c.bf16 %v1888_v22, %v1887_v18  ;;  %v3006_v27 = vmov 0.0|0.0  }
 0x6b8   :  { %2651 = vmatprep.subr.bf16.mxu0 %v3006_v27 }
 0x76d   :  { %v1609_v47 = vpop.f32.mrb[12].mxu0  ;;  %v1680_v50 = vpop.f32.mrb[12].mxu1 }
 0x76e   :  { %v2687_v53 = vadd.f32 %v1609_v47, %v3266_v35  ;;  %v1611_v56 = vpop.f32.mrb[13].mxu0  ;;  %v1682_v60 = vpop.f32.mrb[13].mxu1  ;;  %v2703_v16 = vadd.f32 %v1680_v50, %v3275_v1 }
 0x76f   :  { %v2688_v63 = vadd.f32 %v1611_v56, %v3268_v37  ;;  %v2704_v10 = vadd.f32 %v1682_v60, %v3272_v57 }
 0x770   :  { %v2016_v3 = vmul.f32 -1.442695, %v2687_v53 }
 0x771   :  { %v2017_v6 = vmul.f32 -1.442695, %v2688_v63  ;;  %v2018_v13 = vmul.f32 -1.442695, %v2704_v10 }
 0x772   :  { %2847 = vpow2.f32 %v2016_v3 }
 0x773   :  { %2849 = vpow2.f32 %v2017_v6 }
 0x774   :  { %2851 = vpow2.f32 %v2018_v13 }
 0x775   :  { %2853 = vtanh.f32 %v2703_v16 }
 0x77c   :  { %v2848_v19 = vpop.eup %2847 }
 0x77d   :  { %v2850_v23 = vpop.eup %2849  ;;  %v1692_v26 = vadd.f32 1.0, %v2848_v19 }
 0x77e   :  { %v1698_v29 = vadd.f32 1.0, %v2850_v23  ;;  %v2852_v32 = vpop.eup %2851 }
 0x77f   :  { %2855 = vrcp.f32 %v1692_v26  ;;  %v2854_v36 = vpop.eup %2853  ;;  %v1705_v54 = vadd.f32 1.0, %v2852_v32  ;;  %v2022_v26 = vld [vmem:[%s3557_s5] ss:$0 sm:$0xff] }
 0x780   :  { %2857 = vrcp.f32 %v1698_v29 }
 0x781   :  { %2859 = vrcp.f32 %v1705_v54 }
 0x789   :  { %v2856_v40 = vpop.eup %2855 }
 0x78a   :  { %v2858_v44 = vpop.eup %2857  ;;  %v1709_v48 = vmul.f32 %v2856_v40, %v2854_v36 }
 0x78b   :  { %v1708_v58 = vmul.f32 %v2858_v44, %v3488_v15  ;;  %v2860_v4 = vpop.eup %2859 }
 0x78d   :  { %v3528_v62 = vadd.f32 %v1709_v48, %v1708_v58 }
 0x78f   :  { %2861 = vtanh.f32 %v3528_v62 }
 0x799   :  { %v2862_v9 = vpop.eup %2861 }
 0x79a   :  { %v1712_v14 = vmul.f32 %v2862_v9, %v2860_v4 }
 0x79c   :  { %1782 = vmatmul.mubr.f32.vlgmr.msra.gmra.mrb[14].mxu0 %v1712_v14  ;;  %1853 = vmatmul.mubr.f32.vlgmr.msra.gmra.mrb[14].mxu1 %v1712_v14 }
 0x79d   :  { %2653 = vmatpush3.bf16.msra.mxu0 %v2652_v25  ;;  %2072 = vmatprep.mubr.msk.f32.mxu0 %vm3007_vm0, %v3005_v0 }
 0x79e   :  { %2654 = vmatprep.subr.bf16.mxu0 %v3006_v27 }
 0x7a1   :  { %2656 = vmatpush3.bf16.msra.mxu0 %v2655_v39 }
 0x7a2   :  { %2657 = vmatprep.subr.bf16.mxu0 %v3006_v27 }
 0x7a5   :  { %2659 = vmatpush3.bf16.msra.mxu0 %v2658_v30 }
 0x7a6   :  { %2660 = vmatprep.subr.bf16.mxu0 %v3006_v27 }
 0x7a9   :  { %2662 = vmatpush3.bf16.msra.mxu0 %v2661_v43 }
 0x7aa   :  { %2663 = vmatprep.subr.bf16.mxu0 %v3006_v27 }
 0x7ad   :  { %2665 = vmatpush3.bf16.msra.mxu0 %v2664_v49 }
 0x7ae   :  { %2666 = vmatprep.subr.bf16.mxu0 %v3006_v27 }
 0x7b1   :  { %2668 = vmatpush3.bf16.msra.mxu0 %v2667_v55 }
 0x7b2   :  { %2669 = vmatprep.subr.bf16.mxu0 %v3006_v27 }
 0x7b5   :  { %2671 = vmatpush3.bf16.msra.mxu0 %v2670_v59 }
 0x7b6   :  { %2672 = vmatprep.subr.bf16.mxu0 %v3006_v27 }
 0x7b9   :  { %2674 = vmatpush3.bf16.msra.mxu0 %v2673_v5 }
 0x86f   :  { %v1783_v7 = vpop.f32.mrb[14].mxu0  ;;  %v1854_v8 = vpop.f32.mrb[14].mxu1 }
 0x870   :  { %v2689_v11 = vadd.f32 %v1783_v7, %v3266_v35  ;;  %v1785_v12 = vpop.f32.mrb[15].mxu0  ;;  %v1856_v15 = vpop.f32.mrb[15].mxu1  ;;  %v2705_v50 = vadd.f32 %v1854_v8, %v3275_v1 }
 0x871   :  { %v2690_v17 = vadd.f32 %v1785_v12, %v3268_v37  ;;  %v2706_v0 = vadd.f32 %v1856_v15, %v3272_v57 }
 0x872   :  { %v2019_v20 = vmul.f32 -1.442695, %v2689_v11 }
 0x873   :  { %v2020_v33 = vmul.f32 -1.442695, %v2690_v17  ;;  %v2021_v47 = vmul.f32 -1.442695, %v2706_v0 }
 0x874   :  { %2863 = vpow2.f32 %v2019_v20 }
 0x875   :  { %2865 = vpow2.f32 %v2020_v33 }
 0x876   :  { %2867 = vpow2.f32 %v2021_v47 }
 0x877   :  { %2869 = vtanh.f32 %v2705_v50 }
 0x87e   :  { %v2864_v53 = vpop.eup %2863 }
 0x87f   :  { %v2866_v56 = vpop.eup %2865  ;;  %v1866_v60 = vadd.f32 1.0, %v2864_v53 }
 0x880   :  { %v1872_v63 = vadd.f32 1.0, %v2866_v56  ;;  %v2868_v35 = vpop.eup %2867 }
 0x881   :  { %2871 = vrcp.f32 %v1866_v60  ;;  %v2870_v3 = vpop.eup %2869  ;;  %v1879_v13 = vadd.f32 1.0, %v2868_v35 }
 0x882   :  { %2873 = vrcp.f32 %v1872_v63 }
 0x883   :  { %2875 = vrcp.f32 %v1879_v13 }
 0x88b   :  { %v2872_v37 = vpop.eup %2871 }
 0x88c   :  { %v2874_v6 = vpop.eup %2873  ;;  %v1883_v10 = vmul.f32 %v2872_v37, %v2870_v3 }
 0x88d   :  { %v1882_v16 = vmul.f32 %v2874_v6, %v3528_v62  ;;  %v2876_v1 = vpop.eup %2875 }
 0x88f   :  { %v1884_v57 = vadd.f32 %v1883_v10, %v1882_v16 }
 0x891   :  { %2877 = vtanh.f32 %v1884_v57 }
 0x89b   :  { %v2878_v19 = vpop.eup %2877 }
 0x89c   :  { %v1886_v23 = vmul.f32 %v2878_v19, %v2876_v1 }
 0x89e   :  { %2073 = vmatmul.mubr.f32.vlgmr.msra.gmra.mrb[16].mxu0 %v1886_v23 }
 0x971   :  { %v1976_v29 = vpop.f32.mrb[16].mxu0 }
 0x972   :  { %v1977_v32 = vadd.f32 %v2022_v26, %v1976_v29  ;;  %v2074_v36 = vpop.f32.mrb[17].mxu0 }
 0x974   :  { %1980 = vst [vmem:[#allocation11] sm:$0xff] %v1977_v32 }
 0x975   :  { %2978 = shalt.err (!%p2975_p8)
}
 0x976   :  { %s2979_s28 = scalar_lea.hbm %s3558_s6, 128 }
 0x977   :  { %p2980_p9 = scmp.ne.s32.totalorder %s3558_s6, %s2979_s28  ;;  %p2983_p10 = scmp.lt.u32.totalorder %s2979_s28, %s3558_s6 }
 0x979   :  { %p2985_p11 = pnand %p2983_p10, %p2980_p9 }
 0x97b   :  { %2988 = shalt.err (!%p2985_p11)
}
 0x97c   :  { %1990 = dma.vmem_to_hbm [thread:$0]  %s1988_s24, 128, %s3558_s6, [#allocation5]  }
 0x97d   :  { %2995 = dma.done.wait [#allocation5], 128  }
 0x97e   :  { %2996 = vsyncadd [#allocation5], 4294967168 }
 0x97f   :  { %1994 = vsyncpa [#allocation4], 1 }
 0x980   :  { %1995 = vsyncpa [#allocation7], 1 }
 0x981   :  { %1996 = vsyncpa [#allocation10], 1 }
 0x982   :  { %1997 = vsyncpa [#allocation5], 1 }

</bundles_post_ra>
